<compile_context>
chip_gen: v7x
topology: tpu7x:2x2x1
jax: 0.10.0
libtpu: 0.0.40
codegen_flags: <defaults>
</compile_context>

<pallas_src>
import functools

import jax
import jax.numpy as jnp
from jax.experimental import pallas as pl
from jax.experimental.pallas import tpu as pltpu


def _theme_start_liner_kernel(x_ref, w1_ref, b1_ref, gw_ref, bb_ref, o_ref, *,
                              approximate_gelu):
    x = x_ref[...]                                   # (R, H) native dtype
    xf = x.astype(jnp.float32)

    # linear1 on the MXU: operands in w1's dtype (bf16 fast path), f32 accum.
    h = jnp.dot(x.astype(w1_ref.dtype), w1_ref[...],
                preferred_element_type=jnp.float32)
    h = h + b1_ref[...].astype(jnp.float32)

    if approximate_gelu:
        # tanh-approx GELU: the transcendental lands on the (otherwise idle) EUP.
        c = jnp.float32(0.7978845608028654)          # sqrt(2/pi)
        h = 0.5 * h * (1.0 + jnp.tanh(c * (h + jnp.float32(0.044715) * h * h * h)))
    else:
        # exact (erf) GELU -- matches torch.nn.GELU() default.
        h = 0.5 * h * (1.0 + jax.lax.erf(h * jnp.float32(0.7071067811865475)))

    # dropout: identity at inference.

    # residual + LayerNorm statistics (f32).
    y = h + xf
    mean = jnp.mean(y, axis=-1, keepdims=True)                 # (R, 1)
    cent = y - mean
    var = jnp.mean(cent * cent, axis=-1, keepdims=True)        # (R, 1)
    yn = cent * jax.lax.rsqrt(var + jnp.float32(1e-5))         # normalized, pre-affine

    # LayerNorm affine + Linear(H -> 1) folded into one rank-1 projection:
    #   out = <yn*gamma + beta, w2> + b2 = <yn, gamma*w2> + (<beta, w2> + b2)
    # computed as (1,H) . (R,H)^T so the result is a lane-dense (1, R) row.
    out_row = jax.lax.dot_general(
        gw_ref[...].astype(jnp.float32), yn,
        dimension_numbers=(((1,), (1,)), ((), ())),
        preferred_element_type=jnp.float32)                    # (1, R)

    o_ref[0] = (out_row + bb_ref[0]).astype(o_ref.dtype)


def _round_up(n, m):
    return (n + m - 1) // m * m


def theme_start_liner(x, w1, b1, gamma, beta, w2, b2, *, row_tile=512,
                      mxu_dtype=None, approximate_gelu=False, min_grid_tiles=4):
    """x: (B, S, H) -> (B, S, 1).

    Weights are passed pre-transposed for y = x @ W + b:
      w1: (H, H), b1/gamma/beta: (1, H) or (H,), w2: (H, 1) or (1, H), b2 scalar-ish.
    mxu_dtype: dtype fed to the MXU for the H x H matmul (e.g. jnp.bfloat16);
      defaults to x.dtype.  Residual / LayerNorm math is always f32.
    """
    B, S, H = x.shape
    rows = B * S
    out_dtype = x.dtype
    f32 = jnp.float32
    mxu_dtype = jnp.dtype(mxu_dtype) if mxu_dtype is not None else jnp.dtype(x.dtype)

    # --- row tiling -----------------------------------------------------------
    # Sublane packing of the MXU operand dtype: 8 rows (f32), 16 (bf16), 32 (i8).
    # Clamp so the grid has >= min_grid_tiles steps (pipelining + megacore),
    # then pad rows so the grid divides evenly.  (Prefer 128-multiples of
    # row_tile for MXU M-alignment when rows are large.)
    row_align = max(8, 32 // jnp.dtype(mxu_dtype).itemsize)
    row_tile = min(row_tile, _round_up(pl.cdiv(rows, min_grid_tiles), row_align))
    row_tile = max(row_align, _round_up(row_tile, row_align))
    padded_rows = _round_up(rows, row_tile)
    num_tiles = padded_rows // row_tile

    x2 = x.reshape(rows, H)
    if padded_rows != rows:
        x2 = jnp.pad(x2, ((0, padded_rows - rows), (0, 0)))

    # --- parameter prep (affine fold) ----------------------------------------
    w1m = w1.astype(mxu_dtype)                              # MXU operand dtype
    b1r = jnp.reshape(b1, (1, H)).astype(f32)
    gammar = jnp.reshape(gamma, (1, H)).astype(f32)
    betar = jnp.reshape(beta, (1, H)).astype(f32)
    w2row = jnp.reshape(w2, (1, H)).astype(f32)
    gw = gammar * w2row                                     # (1, H)
    bb = (jnp.sum(betar * w2row)
          + jnp.reshape(b2, ()).astype(f32)).reshape(1)     # SMEM scalar

    # --- VMEM budget / cost estimate ------------------------------------------
    x_it = jnp.dtype(x.dtype).itemsize
    w_it = jnp.dtype(mxu_dtype).itemsize
    o_it = jnp.dtype(out_dtype).itemsize

    def _vmem_needed(weight_bufs):
        return (2 * row_tile * H * x_it                 # x tile, double-buffered
                + weight_bufs * H * H * w_it            # W1
                + weight_bufs * 2 * 8 * H * 4           # b1, gw rows (sublane-padded)
                + 2 * 8 * max(row_tile, 128) * o_it     # output slab, double-buffered
                + 6 * row_tile * H * 4                  # f32 intermediates + slack
                + (1 << 20))                            # misc compiler scratch

    try:
        physical_vmem = int(pltpu.get_tpu_info().vmem_capacity_bytes)
    except Exception:
        physical_vmem = 64 * 1024 * 1024                # conservative (v7x per-TC)

    def _vmem_limit(weight_bufs):
        need = _vmem_needed(weight_bufs)
        limit = max(2 * need, 32 * 1024 * 1024)
        limit = min(limit, int(0.85 * physical_vmem))
        return int(max(limit, need))                    # never below the estimate

    cost = pl.CostEstimate(
        flops=int(2 * padded_rows * H * H               # linear1
                  + 2 * padded_rows * H                 # folded LN-affine + linear2
                  + 10 * padded_rows * H),              # bias/GELU/residual/LN VPU work
        transcendentals=int(padded_rows * H),           # erf or tanh per element
        bytes_accessed=int(padded_rows * H * x_it
                           + padded_rows * o_it
                           + H * H * w_it + 3 * H * 4 + 4),
    )

    # --- pallas_call -----------------------------------------------------------
    const = lambda i: (0, 0)

    def _const_spec(shape, single_buffer):
        if single_buffer:
            # Constant operands never change across grid steps: one buffer is enough.
            return pl.BlockSpec(shape, const, pipeline_mode=pl.Buffered(1))
        return pl.BlockSpec(shape, const)

    def _run(single_buffer_weights):
        return pl.pallas_call(
            functools.partial(_theme_start_liner_kernel,
                              approximate_gelu=approximate_gelu),
            out_shape=jax.ShapeDtypeStruct((num_tiles, 1, row_tile), out_dtype),
            grid_spec=pltpu.PrefetchScalarGridSpec(
                num_scalar_prefetch=0,
                grid=(num_tiles,),
                in_specs=[
                    pl.BlockSpec((row_tile, H), lambda i: (i, 0)),          # x tile
                    _const_spec((H, H), single_buffer_weights),             # W1
                    _const_spec((1, H), single_buffer_weights),             # b1
                    _const_spec((1, H), single_buffer_weights),             # gamma*w2
                    pl.BlockSpec(memory_space=pltpu.MemorySpace.SMEM),      # folded bias
                ],
                out_specs=pl.BlockSpec((1, 1, row_tile), lambda i: (i, 0, 0)),
            ),
            compiler_params=pltpu.CompilerParams(
                dimension_semantics=("parallel",),
                vmem_limit_bytes=_vmem_limit(1 if single_buffer_weights else 2)),
            cost_estimate=cost,
        )(x2, w1m, b1r, gw, bb)

    try:
        out3 = jax.block_until_ready(_run(True))
    except Exception:
        # Fallback if this JAX build rejects single-buffered (Buffered(1)) specs.
        out3 = _run(False)

    out = out3.reshape(padded_rows)[:rows]
    return out.reshape(B, S, 1)


def _reference(x, w1, b1, gamma, beta, w2, b2, *, mxu_dtype=None,
               approximate_gelu=False):
    """Pure-JAX reference matching the PyTorch module (eval mode)."""
    mxu_dtype = jnp.dtype(mxu_dtype) if mxu_dtype is not None else jnp.dtype(x.dtype)
    xf = x.astype(jnp.float32)
    h = jnp.dot(x.astype(mxu_dtype), w1.astype(mxu_dtype),
                preferred_element_type=jnp.float32) + b1.astype(jnp.float32)
    h = jax.nn.gelu(h, approximate=approximate_gelu)
    y = h + xf
    mean = jnp.mean(y, axis=-1, keepdims=True)
    var = jnp.mean((y - mean) ** 2, axis=-1, keepdims=True)
    yn = (y - mean) * jax.lax.rsqrt(var + 1e-5) * gamma + beta
    return (yn @ w2.astype(jnp.float32) + b2).astype(x.dtype)


if __name__ == "__main__":
    B, S, H = 2, 128, 128   # small shapes; hidden=128 keeps the lane axis full

    key = jax.random.PRNGKey(0)
    kx, kw1, kb1, kw2, kb2, kg, kbt = jax.random.split(key, 7)

    x = jax.random.normal(kx, (B, S, H), dtype=jnp.float32)

    # Deterministic synthetic parameters (stored pre-transposed: y = x @ W + b)
    w1 = jax.random.normal(kw1, (H, H), dtype=jnp.float32) * (1.0 / jnp.sqrt(H))
    b1 = jax.random.normal(kb1, (1, H), dtype=jnp.float32) * 0.02
    gamma = 1.0 + 0.05 * jax.random.normal(kg, (1, H), dtype=jnp.float32)
    beta = 0.05 * jax.random.normal(kbt, (1, H), dtype=jnp.float32)
    w2 = jax.random.normal(kw2, (H, 1), dtype=jnp.float32) * (1.0 / jnp.sqrt(H))
    b2 = jax.random.normal(kb2, (1, 1), dtype=jnp.float32) * 0.02

    # 1) Faithful path: f32 operands + exact erf GELU (PyTorch nn.GELU default).
    #    rows=256 with min_grid_tiles=4 -> row_tile=64, 4 pipelined grid steps.
    out = theme_start_liner(x, w1, b1, gamma, beta, w2, b2, row_tile=512,
                            mxu_dtype=jnp.float32, approximate_gelu=False)
    out = jax.block_until_ready(out)
    ref = _reference(x, w1, b1, gamma, beta, w2, b2,
                     mxu_dtype=jnp.float32, approximate_gelu=False)
    assert out.shape == (B, S, 1), out.shape
    assert jnp.allclose(out, ref, atol=5e-5, rtol=5e-5), float(
        jnp.max(jnp.abs(out - ref)))

    # 2) Performance path: bf16 MXU operands + tanh-approx GELU.
    #    Checked against a matched reference (same reduced-precision choices);
    #    vs. the exact-f32 module output the deviation is O(1e-2).
    out_fast = theme_start_liner(x, w1, b1, gamma, beta, w2, b2, row_tile=512,
                                 mxu_dtype=jnp.bfloat16, approximate_gelu=True)
    out_fast = jax.block_until_ready(out_fast)
    ref_fast = _reference(x, w1, b1, gamma, beta, w2, b2,
                          mxu_dtype=jnp.bfloat16, approximate_gelu=True)
    assert jnp.allclose(out_fast, ref_fast, atol=2e-3, rtol=2e-3), float(
        jnp.max(jnp.abs(out_fast - ref_fast)))
    assert jnp.allclose(out_fast, ref, atol=5e-2, rtol=5e-2), float(
        jnp.max(jnp.abs(out_fast - ref)))

    print("KERNEL_OK")
</pallas_src>

<mosaic_0001>
module attributes {stable_mosaic.version = 11 : i64} {
  func.func @_theme_start_liner_kernel(%arg0: i32, %arg1: memref<64x128xf32, #tpu.memory_space<vmem>>, %arg2: memref<128x128xf32, #tpu.memory_space<vmem>>, %arg3: memref<1x128xf32, #tpu.memory_space<vmem>>, %arg4: memref<1x128xf32, #tpu.memory_space<vmem>>, %arg5: memref<1xf32, #tpu.memory_space<smem>>, %arg6: memref<1x1x64xf32, #tpu.memory_space<vmem>>) attributes {dimension_semantics = [#tpu.dimension_semantics<parallel>], iteration_bounds = array<i64: 4>, scalar_prefetch = 0 : i64, scratch_operands = 0 : i64, tpu.core_type = #tpu.core_type<tc>, window_params = [{transform_indices = @transform_0, window_bounds = array<i64: 64, 128>}, {pipeline_mode = #tpu.pipeline_mode<synchronous>, transform_indices = @transform_1, window_bounds = array<i64: 128, 128>}, {pipeline_mode = #tpu.pipeline_mode<synchronous>, transform_indices = @transform_2, window_bounds = array<i64: 1, 128>}, {pipeline_mode = #tpu.pipeline_mode<synchronous>, transform_indices = @transform_3, window_bounds = array<i64: 1, 128>}, {transform_indices = @transform_4, window_bounds = array<i64: 1>}, {transform_indices = @transform_5, window_bounds = array<i64: 1, 1, 64>}]} {
    %c0 = arith.constant 0 : index
    %c0_0 = arith.constant 0 : index
    %0 = vector.load %arg1[%c0, %c0_0] : memref<64x128xf32, #tpu.memory_space<vmem>>, vector<64x128xf32>
    %c0_1 = arith.constant 0 : index
    %c0_2 = arith.constant 0 : index
    %1 = vector.load %arg2[%c0_1, %c0_2] : memref<128x128xf32, #tpu.memory_space<vmem>>, vector<128x128xf32>
    %cst = arith.constant dense<0.000000e+00> : vector<64x128xf32>
    %2 = tpu.matmul %0, %1, %cst {dimension_numbers = #tpu.dot_dimension_numbers<[1], [0], [0], [1], [0, 0, 1, 1], [], []>} : vector<64x128xf32>, vector<128x128xf32>, vector<64x128xf32> -> vector<64x128xf32>
    %c0_3 = arith.constant 0 : index
    %c0_4 = arith.constant 0 : index
    %3 = vector.load %arg3[%c0_3, %c0_4] : memref<1x128xf32, #tpu.memory_space<vmem>>, vector<1x128xf32>
    %4 = vector.broadcast %3 : vector<1x128xf32> to vector<64x128xf32>
    %5 = arith.addf %2, %4 : vector<64x128xf32>
    %cst_5 = arith.constant 5.000000e-01 : f32
    %6 = vector.broadcast %cst_5 : f32 to vector<64x128xf32>
    %7 = arith.mulf %6, %5 : vector<64x128xf32>
    %cst_6 = arith.constant 0.707106769 : f32
    %8 = vector.broadcast %cst_6 : f32 to vector<64x128xf32>
    %9 = arith.mulf %5, %8 : vector<64x128xf32>
    %10 = math.erf %9 : vector<64x128xf32>
    %cst_7 = arith.constant 1.000000e+00 : f32
    %11 = vector.broadcast %cst_7 : f32 to vector<64x128xf32>
    %12 = arith.addf %11, %10 : vector<64x128xf32>
    %13 = arith.mulf %7, %12 : vector<64x128xf32>
    %14 = arith.addf %13, %0 : vector<64x128xf32>
    %cst_8 = arith.constant dense<0.000000e+00> : vector<64xf32>
    %15 = vector.multi_reduction <add>, %14, %cst_8 [1] : vector<64x128xf32> to vector<64xf32>
    %16 = vector.shape_cast %15 : vector<64xf32> to vector<64x1xf32>
    %cst_9 = arith.constant 1.280000e+02 : f32
    %17 = vector.broadcast %cst_9 : f32 to vector<64x1xf32>
    %18 = arith.divf %16, %17 : vector<64x1xf32>
    %19 = vector.broadcast %18 : vector<64x1xf32> to vector<64x128xf32>
    %20 = arith.subf %14, %19 : vector<64x128xf32>
    %21 = arith.mulf %20, %20 : vector<64x128xf32>
    %cst_10 = arith.constant dense<0.000000e+00> : vector<64xf32>
    %22 = vector.multi_reduction <add>, %21, %cst_10 [1] : vector<64x128xf32> to vector<64xf32>
    %23 = vector.shape_cast %22 : vector<64xf32> to vector<64x1xf32>
    %cst_11 = arith.constant 1.280000e+02 : f32
    %24 = vector.broadcast %cst_11 : f32 to vector<64x1xf32>
    %25 = arith.divf %23, %24 : vector<64x1xf32>
    %cst_12 = arith.constant 9.99999974E-6 : f32
    %26 = vector.broadcast %cst_12 : f32 to vector<64x1xf32>
    %27 = arith.addf %25, %26 : vector<64x1xf32>
    %28 = math.rsqrt %27 : vector<64x1xf32>
    %29 = vector.broadcast %28 : vector<64x1xf32> to vector<64x128xf32>
    %30 = arith.mulf %20, %29 : vector<64x128xf32>
    %c0_13 = arith.constant 0 : index
    %c0_14 = arith.constant 0 : index
    %31 = vector.load %arg4[%c0_13, %c0_14] : memref<1x128xf32, #tpu.memory_space<vmem>>, vector<1x128xf32>
    %cst_15 = arith.constant dense<0.000000e+00> : vector<1x64xf32>
    %32 = tpu.matmul %31, %30, %cst_15 {dimension_numbers = #tpu.dot_dimension_numbers<[1], [1], [0], [0], [0, 0, 1, 0], [], []>} : vector<1x128xf32>, vector<64x128xf32>, vector<1x64xf32> -> vector<1x64xf32>
    %c0_16 = arith.constant 0 : index
    %33 = memref.load %arg5[%c0_16] : memref<1xf32, #tpu.memory_space<smem>>
    %34 = vector.broadcast %33 : f32 to vector<1x64xf32>
    %35 = arith.addf %32, %34 : vector<1x64xf32>
    %c0_17 = arith.constant 0 : index
    %c0_18 = arith.constant 0 : index
    %c0_19 = arith.constant 0 : index
    %36 = vector.load %arg6[%c0_17, %c0_18, %c0_19] : memref<1x1x64xf32, #tpu.memory_space<vmem>>, vector<1x1x64xf32>
    %37 = vector.shape_cast %36 : vector<1x1x64xf32> to vector<1x64xf32>
    %38 = vector.shape_cast %35 : vector<1x64xf32> to vector<1x1x64xf32>
    tpu.vector_store %arg6[%c0_17, %c0_18, %c0_19], %38 {strides = array<i32>} : memref<1x1x64xf32, #tpu.memory_space<vmem>>, vector<1x1x64xf32>,
    return
  }
  func.func @transform_0(%arg0: i32) -> (i32, i32) {
    %c0_i32 = arith.constant 0 : i32
    %c0_i32_0 = arith.constant 0 : i32
    return %arg0, %c0_i32 : i32, i32
  }
  func.func @transform_1(%arg0: i32) -> (i32, i32) {
    %c0_i32 = arith.constant 0 : i32
    %c0_i32_0 = arith.constant 0 : i32
    %c0_i32_1 = arith.constant 0 : i32
    return %c0_i32, %c0_i32_0 : i32, i32
  }
  func.func @transform_2(%arg0: i32) -> (i32, i32) {
    %c0_i32 = arith.constant 0 : i32
    %c0_i32_0 = arith.constant 0 : i32
    %c0_i32_1 = arith.constant 0 : i32
    return %c0_i32, %c0_i32_0 : i32, i32
  }
  func.func @transform_3(%arg0: i32) -> (i32, i32) {
    %c0_i32 = arith.constant 0 : i32
    %c0_i32_0 = arith.constant 0 : i32
    %c0_i32_1 = arith.constant 0 : i32
    return %c0_i32, %c0_i32_0 : i32, i32
  }
  func.func @transform_4(%arg0: i32) -> i32 {
    %c0_i32 = arith.constant 0 : i32
    %c0_i32_0 = arith.constant 0 : i32
    return %c0_i32 : i32
  }
  func.func @transform_5(%arg0: i32) -> (i32, i32, i32) {
    %c0_i32 = arith.constant 0 : i32
    %c0_i32_0 = arith.constant 0 : i32
    %c0_i32_1 = arith.constant 0 : i32
    return %arg0, %c0_i32, %c0_i32_0 : i32, i32, i32
  }
}

module attributes {stable_mosaic.version = 11 : i64} {
  func.func @_theme_start_liner_kernel(%arg0: i32, %arg1: memref<64x128xf32, #tpu.memory_space<vmem>>, %arg2: memref<128x128xf32, #tpu.memory_space<vmem>>, %arg3: memref<1x128xf32, #tpu.memory_space<vmem>>, %arg4: memref<1x128xf32, #tpu.memory_space<vmem>>, %arg5: memref<1xf32, #tpu.memory_space<smem>>, %arg6: memref<1x1x64xf32, #tpu.memory_space<vmem>>) attributes {dimension_semantics = [#tpu.dimension_semantics<parallel>], iteration_bounds = array<i64: 4>, scalar_prefetch = 0 : i64, scratch_operands = 0 : i64, tpu.core_type = #tpu.core_type<tc>, window_params = [{transform_indices = @transform_0, window_bounds = array<i64: 64, 128>}, {pipeline_mode = #tpu.pipeline_mode<synchronous>, transform_indices = @transform_1, window_bounds = array<i64: 128, 128>}, {pipeline_mode = #tpu.pipeline_mode<synchronous>, transform_indices = @transform_2, window_bounds = array<i64: 1, 128>}, {pipeline_mode = #tpu.pipeline_mode<synchronous>, transform_indices = @transform_3, window_bounds = array<i64: 1, 128>}, {transform_indices = @transform_4, window_bounds = array<i64: 1>}, {transform_indices = @transform_5, window_bounds = array<i64: 1, 1, 64>}]} {
    %c0 = arith.constant 0 : index
    %c0_0 = arith.constant 0 : index
    %0 = vector.load %arg1[%c0, %c0_0] : memref<64x128xf32, #tpu.memory_space<vmem>>, vector<64x128xf32>
    %c0_1 = arith.constant 0 : index
    %c0_2 = arith.constant 0 : index
    %1 = vector.load %arg2[%c0_1, %c0_2] : memref<128x128xf32, #tpu.memory_space<vmem>>, vector<128x128xf32>
    %cst = arith.constant dense<0.000000e+00> : vector<64x128xf32>
    %2 = tpu.matmul %0, %1, %cst {dimension_numbers = #tpu.dot_dimension_numbers<[1], [0], [0], [1], [0, 0, 1, 1], [], []>} : vector<64x128xf32>, vector<128x128xf32>, vector<64x128xf32> -> vector<64x128xf32>
    %c0_3 = arith.constant 0 : index
    %c0_4 = arith.constant 0 : index
    %3 = vector.load %arg3[%c0_3, %c0_4] : memref<1x128xf32, #tpu.memory_space<vmem>>, vector<1x128xf32>
    %4 = vector.broadcast %3 : vector<1x128xf32> to vector<64x128xf32>
    %5 = arith.addf %2, %4 : vector<64x128xf32>
    %cst_5 = arith.constant 5.000000e-01 : f32
    %6 = vector.broadcast %cst_5 : f32 to vector<64x128xf32>
    %7 = arith.mulf %6, %5 : vector<64x128xf32>
    %cst_6 = arith.constant 0.707106769 : f32
    %8 = vector.broadcast %cst_6 : f32 to vector<64x128xf32>
    %9 = arith.mulf %5, %8 : vector<64x128xf32>
    %10 = math.erf %9 : vector<64x128xf32>
    %cst_7 = arith.constant 1.000000e+00 : f32
    %11 = vector.broadcast %cst_7 : f32 to vector<64x128xf32>
    %12 = arith.addf %11, %10 : vector<64x128xf32>
    %13 = arith.mulf %7, %12 : vector<64x128xf32>
    %14 = arith.addf %13, %0 : vector<64x128xf32>
    %cst_8 = arith.constant dense<0.000000e+00> : vector<64xf32>
    %15 = vector.multi_reduction <add>, %14, %cst_8 [1] : vector<64x128xf32> to vector<64xf32>
    %16 = vector.shape_cast %15 : vector<64xf32> to vector<64x1xf32>
    %cst_9 = arith.constant 1.280000e+02 : f32
    %17 = vector.broadcast %cst_9 : f32 to vector<64x1xf32>
    %18 = arith.divf %16, %17 : vector<64x1xf32>
    %19 = vector.broadcast %18 : vector<64x1xf32> to vector<64x128xf32>
    %20 = arith.subf %14, %19 : vector<64x128xf32>
    %21 = arith.mulf %20, %20 : vector<64x128xf32>
    %cst_10 = arith.constant dense<0.000000e+00> : vector<64xf32>
    %22 = vector.multi_reduction <add>, %21, %cst_10 [1] : vector<64x128xf32> to vector<64xf32>
    %23 = vector.shape_cast %22 : vector<64xf32> to vector<64x1xf32>
    %cst_11 = arith.constant 1.280000e+02 : f32
    %24 = vector.broadcast %cst_11 : f32 to vector<64x1xf32>
    %25 = arith.divf %23, %24 : vector<64x1xf32>
    %cst_12 = arith.constant 9.99999974E-6 : f32
    %26 = vector.broadcast %cst_12 : f32 to vector<64x1xf32>
    %27 = arith.addf %25, %26 : vector<64x1xf32>
    %28 = math.rsqrt %27 : vector<64x1xf32>
    %29 = vector.broadcast %28 : vector<64x1xf32> to vector<64x128xf32>
    %30 = arith.mulf %20, %29 : vector<64x128xf32>
    %c0_13 = arith.constant 0 : index
    %c0_14 = arith.constant 0 : index
    %31 = vector.load %arg4[%c0_13, %c0_14] : memref<1x128xf32, #tpu.memory_space<vmem>>, vector<1x128xf32>
    %cst_15 = arith.constant dense<0.000000e+00> : vector<1x64xf32>
    %32 = tpu.matmul %31, %30, %cst_15 {dimension_numbers = #tpu.dot_dimension_numbers<[1], [1], [0], [0], [0, 0, 1, 0], [], []>} : vector<1x128xf32>, vector<64x128xf32>, vector<1x64xf32> -> vector<1x64xf32>
    %c0_16 = arith.constant 0 : index
    %33 = memref.load %arg5[%c0_16] : memref<1xf32, #tpu.memory_space<smem>>
    %34 = vector.broadcast %33 : f32 to vector<1x64xf32>
    %35 = arith.addf %32, %34 : vector<1x64xf32>
    %c0_17 = arith.constant 0 : index
    %c0_18 = arith.constant 0 : index
    %c0_19 = arith.constant 0 : index
    %36 = vector.load %arg6[%c0_17, %c0_18, %c0_19] : memref<1x1x64xf32, #tpu.memory_space<vmem>>, vector<1x1x64xf32>
    %37 = vector.shape_cast %36 : vector<1x1x64xf32> to vector<1x64xf32>
    %38 = vector.shape_cast %35 : vector<1x64xf32> to vector<1x1x64xf32>
    tpu.vector_store %arg6[%c0_17, %c0_18, %c0_19], %38 {strides = array<i32>} : memref<1x1x64xf32, #tpu.memory_space<vmem>>, vector<1x1x64xf32>,
    return
  }
  func.func @transform_0(%arg0: i32) -> (i32, i32) {
    %c0_i32 = arith.constant 0 : i32
    %c0_i32_0 = arith.constant 0 : i32
    return %arg0, %c0_i32 : i32, i32
  }
  func.func @transform_1(%arg0: i32) -> (i32, i32) {
    %c0_i32 = arith.constant 0 : i32
    %c0_i32_0 = arith.constant 0 : i32
    %c0_i32_1 = arith.constant 0 : i32
    return %c0_i32, %c0_i32_0 : i32, i32
  }
  func.func @transform_2(%arg0: i32) -> (i32, i32) {
    %c0_i32 = arith.constant 0 : i32
    %c0_i32_0 = arith.constant 0 : i32
    %c0_i32_1 = arith.constant 0 : i32
    return %c0_i32, %c0_i32_0 : i32, i32
  }
  func.func @transform_3(%arg0: i32) -> (i32, i32) {
    %c0_i32 = arith.constant 0 : i32
    %c0_i32_0 = arith.constant 0 : i32
    %c0_i32_1 = arith.constant 0 : i32
    return %c0_i32, %c0_i32_0 : i32, i32
  }
  func.func @transform_4(%arg0: i32) -> i32 {
    %c0_i32 = arith.constant 0 : i32
    %c0_i32_0 = arith.constant 0 : i32
    return %c0_i32 : i32
  }
  func.func @transform_5(%arg0: i32) -> (i32, i32, i32) {
    %c0_i32 = arith.constant 0 : i32
    %c0_i32_0 = arith.constant 0 : i32
    %c0_i32_1 = arith.constant 0 : i32
    return %arg0, %c0_i32, %c0_i32_0 : i32, i32, i32
  }
}

</mosaic_0001>

<bundles_post_ra>
// kernel: tpu_custom_call.1
= control target key start
LH: loop header
LB: loop body
LE: loop exit
PB: predicated region body
PF: predicated region fallthrough
CT: control target
= control target key end

     0   :  { %s1401_s0 = inlined_call_operand.hbm [shape: f32[256,128], index: 0, kind: input, shape index: {}]   ;;  %s1402_s1 = inlined_call_operand.hbm [shape: f32[128,128], index: 1, kind: input, shape index: {}]   ;;  %s1403_s2 = inlined_call_operand.vmem [shape: f32[1,128], index: 2, kind: input, shape index: {}]   ;;  %s1404_s3 = inlined_call_operand.vmem [shape: f32[1,128], index: 3, kind: input, shape index: {}]   ;;  %s1405_s4 = inlined_call_operand.<no memory space> [shape: f32[1], index: 4, kind: input, shape index: {}]   ;;  %s1406_s5 = inlined_call_operand.hbm [shape: f32[4,1,64], index: 5, kind: output, shape index: {}]  }
   0x1   :  { %10 = sst [smem:[#allocation2]] %s1405_s4 }
   0x2   :  { %11 = vsyncpa [#allocation4], 0 }
   0x3   :  { %13 = vsyncpa [#allocation4 + $0x1], 0 }
   0x4   :  { %14 = vsyncpa [#allocation7], 0 }
   0x5   :  { %15 = vsyncpa [#allocation5], 0 }
   0x6   :  { %17 = vsyncpa [#allocation5 + $0x1], 0  ;;  %s1116_s20 = smov 0   ;;  %s1118_s21 = smov 0  }
   0x7   :  { %s1120_s22 = smov 0   ;;  %s1122_s23 = smov 0  }
   0x8 LB: > { %s1137_s4 = sadd.s32 4294967295, %s1073_s23   ;;  %s696_s24 = sadd.s32 4294967294, %s1073_s23   ;;  %s1073_s23 = sphi %s1122_s23, %s1425_s23   ;;  %s1069_s22 = sphi %s1120_s22, %s1424_s22   ;;  %s1065_s21 = sphi %s1118_s21, %s1423_s21   ;;  %s1061_s20 = sphi %s1116_s20, %s1422_s20  }
   0x9   : > { %p43_p0 = scmp.ne.s32.totalorder %s1065_s21, %s1061_s20  ;;  %p1407_p1 = scmp.eq.s32.totalorder %s1137_s4, 0 }
   0xa   : > { %p157_p3 = scmp.eq.s32.totalorder %s696_s24, 3  ;;  %p697_p5 = scmp.ge.s32.totalorder %s1073_s23, 1 }
   0xb   : > { %p1146_p4 = por %p1407_p1, %p43_p0  ;;  %p164_p7 = scmp.lt.s32.totalorder %s1073_s23, 5 }
   0xc   : > { %p1151_p6 = por %p157_p3, %p43_p0  ;;  %s1075_s28 = smov [#allocation6]  }
   0xd   : > { %s1410_s25 = scalar_select %p1146_p4, 1, 0 }
   0xe   : > { %s1411_s26 = scalar_select %p1151_p6, 1, 0 }
   0xf   : > { %p1156_p8 = pnand %p697_p5, %p164_p7  ;;  %s176_s29 = sshll.u32 %s1075_s28, 4  ;;  %s177_s29 = int_to_ptr.vmem [resolvable:$true] %s176_s29 }
  0x10   : > { %s1169_s6 = sadd.s32 1, %s1073_s23   ;;  %s30_s7 = sadd.s32 1, %s1069_s22 }
  0x11   : > { %s1412_s27 = scalar_select %p1156_p8, 1, 0 }
  0x12   : > { %p859_p9 = pneg %p1156_p8  ;;  %s27_s8 = ssub.s32 %s1073_s23, %s1169_s6 }
  0x13   : > { %s945_s11 = scalar_lea.hbm %s1402_s1, 2048 }
  0x14   : > { %p1164_p10 = pnand %p859_p9, %p1407_p1  ;;  %p946_p11 = scmp.ne.s32.totalorder %s1402_s1, %s945_s11 }
  0x15   : > { %p952_p3 = scmp.lt.u32.totalorder %s945_s11, %s1402_s1 }
  0x16   : > { %p947_p12 = pneg %p1164_p10 }
  0x18   : > { %p948_p13 = pnand %p947_p12, %p946_p11 }
  0x1a   : > { %p949_p0 = pneg %p948_p13 }
  0x1c   : > { %p954_p5 = pnand %p952_p3, %p949_p0 }
  0x1e   : > { %957 = shalt.err (!%p954_p5)
}
  0x1f   : > { %s958_s16 = scalar_lea.vmem %s177_s29, 2048  ;;  %p966_p2 = scmp.lt.s32.totalorder %s177_s29, %s177_s29 }
  0x20   : > { %p959_p7 = scmp.ne.s32.totalorder %s177_s29, %s958_s16  ;;  %p967_p6 = scmp.lt.s32.totalorder %s958_s16, %s958_s16 }
  0x22   : > { %p961_p9 = pnand %p959_p7, %p947_p12  ;;  %p968_p4 = por %p967_p6, %p966_p2 }
  0x24   : > { %p962_p1 = pneg %p961_p9 }
  0x26   : > { %p969_p8 = pnand %p968_p4, %p962_p1 }
  0x28   : > { %972 = shalt.err (!%p969_p8)
}
  0x29   : > { %s1076_s17 = smov 128   ;;  %s1077_s18 = smov 8  }
  0x2a   : > { %862 = dma.hbm_to_vmem [thread:$0]  (!%p1164_p10), %s1402_s1, 2048, %s177_s29, [#allocation7], %s1076_s17, %s1076_s17, %s1077_s18  }
  0x2b   : > { %p28_p1 = scmp.eq.s32.totalorder %s27_s8, 0  ;;  %p37_p2 = scmp.ne.s32.totalorder %s1069_s22, %s1065_s21 }
  0x2c   : > { %p38_p4 = scmp.eq.s32.totalorder %s1073_s23, 0  ;;  %p872_p6 = scmp.lt.s32.totalorder %s1073_s23, 4 }
  0x2d   : > { %s1198_s28 = scalar_select %p28_p1, %s1069_s22, %s30_s7  }
  0x2e   : > { %p39_p8 = por %p38_p4, %p37_p2  ;;  %p1414_p11 = scmp.eq.s32.totalorder %s1137_s4, 3 }
  0x2f   : > { %s199_s30 = sand.u32 1, %s1069_s22   ;;  %s710_s10 = sshll.u32 %s1073_s23, 10 }
  0x30   : > { %p1202_p12 = por %p1414_p11, %p37_p2  ;;  %s700_s11 = sshll.u32 %s199_s30, 6 }
  0x31   : > { %s1211_s14 = scalar_lea.hbm %s1401_s0, %s710_s10  ;;  %s203_s29 = scalar_lea.vmem [#allocation3], %s700_s11 }
  0x32   : > { %s210_s7 = sshll.u32 %s203_s29, 4  ;;  %p1213_p10 = pnand %p872_p6, %p39_p8  ;;  %s1217_s7 = int_to_ptr.vmem [resolvable:$true] %s210_s7 }
  0x33   : > { %s1219_s15 = scalar_lea.sflag [#allocation4], %s199_s30  ;;  %s973_s16 = scalar_lea.hbm %s1211_s14, 1024 }
  0x34   : > { %p974_p13 = scmp.ne.s32.totalorder %s1211_s14, %s973_s16  ;;  %p975_p0 = pneg %p1213_p10 }
  0x35   : > { %s978_s10 = scalar_lea.hbm %s1401_s0, 4096  ;;  %p979_p7 = scmp.lt.u32.totalorder %s1211_s14, %s1401_s0 }
  0x36   : > { %p976_p3 = pnand %p975_p0, %p974_p13  ;;  %p980_p9 = scmp.lt.u32.totalorder %s978_s10, %s973_s16 }
  0x37   : > { %p982_p2 = scmp.lt.u32.totalorder %s973_s16, %s1211_s14 }
  0x38   : > { %p977_p5 = pneg %p976_p3  ;;  %p981_p1 = por %p980_p9, %p979_p7 }
  0x3a   : > { %p983_p4 = por %p982_p2, %p981_p1 }
  0x3c   : > { %p984_p6 = pnand %p983_p4, %p977_p5 }
  0x3e   : > { %987 = shalt.err (!%p984_p6)
}
  0x3f   : > { %s988_s30 = scalar_lea.vmem %s1217_s7, 1024  ;;  %s1078_s13 = smov [#allocation3]  }
  0x40   : > { %p989_p8 = scmp.ne.s32.totalorder %s1217_s7, %s988_s30  ;;  %s993_s29 = sshll.u32 %s1078_s13, 4  ;;  %s994_s29 = int_to_ptr.vmem [resolvable:$false] %s993_s29 }
  0x41   : > { %s995_s19 = scalar_lea.vmem %s994_s29, 2048  ;;  %p996_p3 = scmp.lt.s32.totalorder %s1217_s7, %s994_s29 }
  0x42   : > { %p991_p11 = pnand %p989_p8, %p975_p0  ;;  %p997_p7 = scmp.lt.s32.totalorder %s995_s19, %s988_s30 }
  0x44   : > { %p992_p13 = pneg %p991_p11  ;;  %p998_p9 = por %p997_p7, %p996_p3 }
  0x46   : > { %p999_p1 = pnand %p998_p9, %p992_p13 }
  0x48   : > { %1002 = shalt.err (!%p999_p1)
}
  0x49   : > { %866 = dma.hbm_to_vmem [thread:$0]  (!%p1213_p10), %s1211_s14, 1024, %s1217_s7, %s1219_s15, %s1076_s17, %s1076_s17, %s1077_s18  }
  0x4a   : > { %p1417_p0 = scmp.ne.s32.totalorder %s1412_s27, 0 }
  0x4b   : > { %s1253_s16 = sand.u32 (!%p1417_p0), 1, %s1065_s21   ;;  %p1418_p5 = scmp.ne.s32.totalorder (!%p1417_p0), %s1410_s25, 0 }
  0x4c   : > { %222 = sbr.rel (%p1417_p0) target bundleno = 928 (0x3a0), region = 40  ;;  %s704_s24 = sshll.u32 (!%p1417_p0), %s1253_s16, 6 }
  0x4d   : > { %s225_s10 = scalar_lea.sflag (!%p1417_p0), [#allocation4], %s1253_s16  ;;  %s1257_s11 = scalar_lea.vmem (!%p1417_p0), [#allocation3], %s704_s24 }
  0x53   : > { %1048 = dma.done.wait (%p1418_p5), %s225_s10, 1024  }
  0x54   : > { %1050 = vsyncadd (%p1418_p5), %s225_s10, 4294966272  ;;  %p1419_p10 = scmp.eq.s32.totalorder %s1137_s4, 0 }
  0x56   : > { %1052 = dma.done.wait (%p1419_p10), [#allocation7], 2048   ;;  %p1420_p2 = pmov %p1419_p10 }
  0x57   : > { %v267_v0 = vld [vmem:[#allocation6] sm:$0xff]  ;;  %v268_v1 = vld [vmem:[#allocation6 + $0x8] sm:$0xff]  ;;  %v269_v2 = vld [vmem:[#allocation6 + $0x10] sm:$0xff]  ;;  %vm1080_vm0 = vmmov 0   ;;  %s533_s14 = sld [smem:[#allocation2]]  ;;  %s707_s7 = sshll.u32 %s1137_s4, 4 }
  0x58   : > { %1054 = vsyncadd (%p1420_p2), [#allocation7], 4294965248  ;;  %v807_v3 = vpack.c.bf16 %v268_v1, %v267_v0  ;;  %v270_v4 = vld [vmem:[#allocation6 + $0x18] sm:$0xff]  ;;  %v271_v6 = vld [vmem:[#allocation6 + $0x20] sm:$0xff]  ;;  %s257_s8 = scalar_lea.vmem [#allocation8], %s1253_s16  ;;  %vm605_vm1 = vcmask 516096   ;;  %s1358_s13 = scalar_lea.hbm %s1406_s5, %s707_s7 }
  0x59   : > { %v811_v5 = vpack.c.bf16 %v270_v4, %v269_v2  ;;  %v272_v7 = vld [vmem:[#allocation6 + $0x28] sm:$0xff]  ;;  %v1268_v9 = vld [vmem:[%s1257_s11] sm:$0xff]  ;;  %v273_v10 = vld [vmem:[#allocation6 + $0x30] sm:$0xff]  ;;  %s620_s15 = sshll.u32 %s257_s8, 4  ;;  %s608_s29 = scalar_lea.sflag [#allocation5], %s1253_s16  ;;  %s1360_s15 = int_to_ptr.vmem [resolvable:$true] %s620_s15 }
  0x5a   : > { %808 = vmatprep.subr.bf16.mxu0 %v807_v3  ;;  %v815_v8 = vpack.c.bf16 %v272_v7, %v271_v6  ;;  %v274_v11 = vld [vmem:[#allocation6 + $0x38] sm:$0xff]  ;;  %776 = vmatprep.mubr.f32.mxu0 %v1268_v9  ;;  %v275_v13 = vld [vmem:[#allocation6 + $0x40] sm:$0xff]  ;;  %v276_v14 = vld [vmem:[#allocation6 + $0x48] sm:$0xff]  ;;  %s1003_s19 = scalar_lea.vmem %s1360_s15, 16  ;;  %s1082_s4 = smov [#allocation8]  }
  0x5b   : > { %810 = vmatpush3.bf16.msra.mxu0 %v807_v3  ;;  %v819_v12 = vpack.c.bf16 %v274_v11, %v273_v10  ;;  %v823_v15 = vpack.c.bf16 %v276_v14, %v275_v13  ;;  %v277_v16 = vld [vmem:[#allocation6 + $0x50] sm:$0xff]  ;;  %v278_v17 = vld [vmem:[#allocation6 + $0x58] sm:$0xff]  ;;  %v279_v19 = vld [vmem:[#allocation6 + $0x60] sm:$0xff]  ;;  %p1004_p4 = scmp.ne.s32.totalorder %s1360_s15, %s1003_s19  ;;  %s1007_s24 = sshll.u32 %s1082_s4, 4  ;;  %s1008_s24 = int_to_ptr.vmem [resolvable:$false] %s1007_s24 }
  0x5c   : > { %812 = vmatprep.subr.bf16.mxu0 %v811_v5  ;;  %v827_v18 = vpack.c.bf16 %v278_v17, %v277_v16  ;;  %v280_v20 = vld [vmem:[#allocation6 + $0x68] sm:$0xff]  ;;  %v281_v22 = vld [vmem:[#allocation6 + $0x70] sm:$0xff]  ;;  %v282_v23 = vld [vmem:[#allocation6 + $0x78] sm:$0xff]  ;;  %s1009_s10 = scalar_lea.vmem %s1008_s24, 32  ;;  %p1010_p11 = scmp.lt.s32.totalorder %s1360_s15, %s1008_s24 }
  0x5d   : > { %v831_v21 = vpack.c.bf16 %v280_v20, %v279_v19  ;;  %v835_v24 = vpack.c.bf16 %v282_v23, %v281_v22  ;;  %v1272_v25 = vld [vmem:[%s1257_s11 + $0x8] sm:$0xff]  ;;  %v1275_v26 = vld [vmem:[%s1257_s11 + $0x10] sm:$0xff]  ;;  %v1280_v27 = vld [vmem:[%s1257_s11 + $0x18] sm:$0xff]  ;;  %p1005_p6 = pnand %p1004_p4, %p1202_p12  ;;  %p1011_p13 = scmp.lt.s32.totalorder %s1009_s10, %s1003_s19 }
  0x5e   : > { %v1283_v28 = vld [vmem:[%s1257_s11 + $0x20] sm:$0xff]  ;;  %v1288_v29 = vld [vmem:[%s1257_s11 + $0x28] sm:$0xff]  ;;  %v1291_v30 = vld [vmem:[%s1257_s11 + $0x30] sm:$0xff] }
  0x5f   : > { %814 = vmatpush3.bf16.msra.mxu0 %v811_v5  ;;  %v1296_v31 = vld [vmem:[%s1257_s11 + $0x38] sm:$0xff]  ;;  %v706_v32 = vld [vmem:[%s1403_s2] ss:$0 sm:$0xff]  ;;  %p1006_p8 = pneg %p1005_p6  ;;  %p1012_p3 = por %p1011_p13, %p1010_p11 }
  0x60   : > { %816 = vmatprep.subr.bf16.mxu0 %v815_v8 }
  0x61   : > { %p1013_p7 = pnand %p1012_p3, %p1006_p8 }
  0x63   : > { %818 = vmatpush3.bf16.msra.mxu0 %v815_v8 }
  0x64   : > { %820 = vmatprep.subr.bf16.mxu0 %v819_v12 }
  0x67   : > { %822 = vmatpush3.bf16.msra.mxu0 %v819_v12 }
  0x68   : > { %824 = vmatprep.subr.bf16.mxu0 %v823_v15 }
  0x6b   : > { %826 = vmatpush3.bf16.msra.mxu0 %v823_v15 }
  0x6c   : > { %828 = vmatprep.subr.bf16.mxu0 %v827_v18 }
  0x6f   : > { %830 = vmatpush3.bf16.msra.mxu0 %v827_v18 }
  0x70   : > { %832 = vmatprep.subr.bf16.mxu0 %v831_v21 }
  0x73   : > { %834 = vmatpush3.bf16.msra.mxu0 %v831_v21 }
  0x74   : > { %836 = vmatprep.subr.bf16.mxu0 %v835_v24 }
  0x77   : > { %838 = vmatpush3.bf16.msra.mxu0 %v835_v24 }
  0x7a   : > { %777 = vmatmul.mubr.f32.vlgmr.msra.gmra.mrb[0].mxu0 %v1272_v25 }
  0x7b   : > { %779 = vmatprep.mubr.f32.mxu0 %v1275_v26 }
  0x7e   : > { %780 = vmatmul.mubr.f32.gmra.mrb[2].mxu0 %v1280_v27 }
  0x7f   : > { %782 = vmatprep.mubr.f32.mxu0 %v1283_v28 }
  0x82   : > { %783 = vmatmul.mubr.f32.gmra.mrb[4].mxu0 %v1288_v29 }
  0x83   : > { %785 = vmatprep.mubr.f32.mxu0 %v1291_v30 }
  0x86   : > { %786 = vmatmul.mubr.f32.gmra.mrb[6].mxu0 %v1296_v31 }
 0x14d   : > { %v778_v33 = vpop.f32.mrb[0].mxu0 }
 0x14e   : > { %v362_v34 = vadd.f32 %v778_v33, %v706_v32  ;;  %v356_v35 = vpop.f32.mrb[1].mxu0 }
 0x14f   : > { %v357_v36 = vadd.f32 %v706_v32, %v356_v35 }
 0x150   : > { %v404_v37 = vmul.f32 0.70710677, %v362_v34  ;;  %v396_v63 = vmul.f32 0.5, %v362_v34 }
 0x151   : > { %v403_v38 = vmul.f32 0.70710677, %v357_v36  ;;  %v781_v39 = vpop.f32.mrb[2].mxu0  ;;  %v395_v59 = vmul.f32 0.5, %v357_v36 }
 0x152   : > { %913 = verf.f32 %v404_v37  ;;  %v372_v40 = vadd.f32 %v781_v39, %v706_v32  ;;  %v366_v41 = vpop.f32.mrb[3].mxu0 }
 0x153   : > { %915 = verf.f32 %v403_v38  ;;  %v367_v42 = vadd.f32 %v706_v32, %v366_v41 }
 0x154   : > { %v406_v43 = vmul.f32 0.70710677, %v372_v40  ;;  %v398_v7 = vmul.f32 0.5, %v372_v40 }
 0x155   : > { %v405_v44 = vmul.f32 0.70710677, %v367_v42  ;;  %v784_v45 = vpop.f32.mrb[4].mxu0  ;;  %v397_v3 = vmul.f32 0.5, %v367_v42 }
 0x156   : > { %917 = verf.f32 %v406_v43  ;;  %v382_v46 = vadd.f32 %v784_v45, %v706_v32  ;;  %v376_v47 = vpop.f32.mrb[5].mxu0 }
 0x157   : > { %919 = verf.f32 %v405_v44  ;;  %v377_v48 = vadd.f32 %v706_v32, %v376_v47 }
 0x158   : > { %v408_v49 = vmul.f32 0.70710677, %v382_v46  ;;  %v400_v12 = vmul.f32 0.5, %v382_v46 }
 0x159   : > { %v407_v50 = vmul.f32 0.70710677, %v377_v48  ;;  %v787_v51 = vpop.f32.mrb[6].mxu0  ;;  %v399_v13 = vmul.f32 0.5, %v377_v48 }
 0x15a   : > { %921 = verf.f32 %v408_v49  ;;  %v392_v52 = vadd.f32 %v787_v51, %v706_v32  ;;  %v386_v53 = vpop.f32.mrb[7].mxu0 }
 0x15b   : > { %923 = verf.f32 %v407_v50  ;;  %v387_v54 = vadd.f32 %v706_v32, %v386_v53 }
 0x15c   : > { %v914_v55 = vpop.eup %913  ;;  %v410_v56 = vmul.f32 0.70710677, %v392_v52  ;;  %v402_v22 = vmul.f32 0.5, %v392_v52 }
 0x15d   : > { %v916_v57 = vpop.eup %915  ;;  %v409_v58 = vmul.f32 0.70710677, %v387_v54  ;;  %v420_v61 = vadd.f32 1.0, %v914_v55  ;;  %v401_v20 = vmul.f32 0.5, %v387_v54 }
 0x15e   : > { %925 = verf.f32 %v410_v56  ;;  %v419_v60 = vadd.f32 1.0, %v916_v57 }
 0x15f   : > { %927 = verf.f32 %v409_v58  ;;  %v428_v6 = vmul.f32 %v420_v61, %v396_v63 }
 0x160   : > { %v918_v62 = vpop.eup %917  ;;  %v427_v0 = vmul.f32 %v419_v60, %v395_v59 }
 0x161   : > { %v920_v1 = vpop.eup %919  ;;  %v422_v2 = vadd.f32 1.0, %v918_v62  ;;  %v436_v16 = vadd.f32 %v428_v6, %v1272_v25 }
 0x162   : > { %v435_v4 = vadd.f32 %v427_v0, %v1268_v9  ;;  %v421_v5 = vadd.f32 1.0, %v920_v1  ;;  %v1079_v1 = vmov 0.0|0.0  }
 0x163   : > { %v430_v14 = vmul.f32 %v422_v2, %v398_v7  ;;  %839 = vmatprep.subr.bf16.mxu1 %v1079_v1  ;;  %v1081_v2 = vmov 0.0  }
 0x164   : > { %v922_v8 = vpop.eup %921  ;;  %443 = vadd.xlane.f32.xlu0 %v435_v4  ;;  %v429_v10 = vmul.f32 %v421_v5, %v397_v3  ;;  %804 = vmatprep.mubr.msk.f32.mxu1 %vm1080_vm0, %v1081_v2 }
 0x165   : > { %v924_v11 = vpop.eup %923  ;;  %v424_v18 = vadd.f32 1.0, %v922_v8  ;;  %v438_v23 = vadd.f32 %v430_v14, %v1280_v27 }
 0x166   : > { %v437_v15 = vadd.f32 %v429_v10, %v1275_v26  ;;  %v423_v17 = vadd.f32 1.0, %v924_v11 }
 0x167   : > { %v432_v32 = vmul.f32 %v424_v18, %v400_v12 }
 0x168   : > { %v926_v19 = vpop.eup %925  ;;  %447 = vadd.xlane.f32.xlu1 %v437_v15  ;;  %445 = vadd.xlane.f32.xlu0 %v436_v16  ;;  %v431_v9 = vmul.f32 %v423_v17, %v399_v13 }
 0x169   : > { %v928_v21 = vpop.eup %927  ;;  %v426_v34 = vadd.f32 1.0, %v926_v19  ;;  %v440_v25 = vadd.f32 %v432_v32, %v1288_v29 }
 0x16a   : > { %v439_v24 = vadd.f32 %v431_v9, %v1283_v28  ;;  %v425_v33 = vadd.f32 1.0, %v928_v21 }
 0x16b   : > { %v434_v36 = vmul.f32 %v426_v34, %v402_v22 }
 0x16c   : > { %449 = vadd.xlane.f32.xlu1 %v438_v23  ;;  %451 = vadd.xlane.f32.xlu0 %v439_v24  ;;  %v433_v26 = vmul.f32 %v425_v33, %v401_v20 }
 0x16d   : > { %v442_v37 = vadd.f32 %v434_v36, %v1296_v31 }
 0x16e   : > { %v441_v35 = vadd.f32 %v433_v26, %v1291_v30 }
 0x170   : > { %453 = vadd.xlane.f32.xlu1 %v440_v25  ;;  %455 = vadd.xlane.f32.xlu0 %v441_v35 }
 0x174   : > { %457 = vadd.xlane.f32.xlu1 %v442_v37 }
 0x1f1   : > { %v444_v38 = vpop.xlane.xlu0 %443 }
 0x1f2   : > { %v460_v27 = vmul.f32 0.0078125, %v444_v38 }
 0x1f4   : > { %v1310_v39 = vsub.f32 %v435_v4, %v460_v27 }
 0x1f5   : > { %v448_v28 = vpop.xlane.xlu1 %447  ;;  %v446_v40 = vpop.xlane.xlu0 %445 }
 0x1f6   : > { %v462_v41 = vmul.f32 0.0078125, %v448_v28  ;;  %v461_v42 = vmul.f32 0.0078125, %v446_v40  ;;  %v476_v43 = vmul.f32 %v1310_v39, %v1310_v39 }
 0x1f8   : > { %v1314_v29 = vsub.f32 %v437_v15, %v462_v41  ;;  %v1316_v30 = vsub.f32 %v436_v16, %v461_v42  ;;  %484 = vadd.xlane.f32.xlu0 %v476_v43 }
 0x1f9   : > { %v450_v44 = vpop.xlane.xlu1 %449  ;;  %v452_v45 = vpop.xlane.xlu0 %451 }
 0x1fa   : > { %v463_v31 = vmul.f32 0.0078125, %v450_v44  ;;  %v464_v46 = vmul.f32 0.0078125, %v452_v45  ;;  %v478_v47 = vmul.f32 %v1314_v29, %v1314_v29  ;;  %v477_v48 = vmul.f32 %v1316_v30, %v1316_v30 }
 0x1fc   : > { %v1322_v49 = vsub.f32 %v438_v23, %v463_v31  ;;  %v1324_v50 = vsub.f32 %v439_v24, %v464_v46  ;;  %488 = vadd.xlane.f32.xlu0 %v478_v47  ;;  %486 = vadd.xlane.f32.xlu1 %v477_v48  ;;  %v532_v47 = vld [vmem:[%s1404_s3] sm:$0x1]  ;;  %v534_v48 = vstv %s533_s14 }
 0x1fd   : > { %v454_v51 = vpop.xlane.xlu1 %453  ;;  %v456_v52 = vpop.xlane.xlu0 %455 }
 0x1fe   : > { %v465_v53 = vmul.f32 0.0078125, %v454_v51  ;;  %v466_v54 = vmul.f32 0.0078125, %v456_v52  ;;  %v479_v55 = vmul.f32 %v1322_v49, %v1322_v49  ;;  %v480_v56 = vmul.f32 %v1324_v50, %v1324_v50 }
 0x200   : > { %v1330_v57 = vsub.f32 %v440_v25, %v465_v53  ;;  %v1332_v58 = vsub.f32 %v441_v35, %v466_v54  ;;  %490 = vadd.xlane.f32.xlu1 %v479_v55  ;;  %492 = vadd.xlane.f32.xlu0 %v480_v56 }
 0x201   : > { %v458_v59 = vpop.xlane.xlu1 %457 }
 0x202   : > { %v467_v60 = vmul.f32 0.0078125, %v458_v59  ;;  %v481_v61 = vmul.f32 %v1330_v57, %v1330_v57  ;;  %v482_v62 = vmul.f32 %v1332_v58, %v1332_v58 }
 0x204   : > { %v1338_v63 = vsub.f32 %v442_v37, %v467_v60  ;;  %494 = vadd.xlane.f32.xlu1 %v481_v61  ;;  %496 = vadd.xlane.f32.xlu0 %v482_v62 }
 0x206   : > { %v483_v0 = vmul.f32 %v1338_v63, %v1338_v63 }
 0x208   : > { %498 = vadd.xlane.f32.xlu1 %v483_v0 }
 0x285   : > { %v485_v3 = vpop.xlane.xlu0 %484 }
 0x286   : > { %v500_v4 = vmul.f32 0.0078125, %v485_v3 }
 0x288   : > { %v508_v5 = vadd.f32 1e-05, %v500_v4 }
 0x289   : > { %v487_v6 = vpop.xlane.xlu1 %486  ;;  %v489_v7 = vpop.xlane.xlu0 %488 }
 0x28a   : > { %v501_v8 = vmul.f32 0.0078125, %v487_v6  ;;  %929 = vrsqrt.f32 %v508_v5  ;;  %v502_v11 = vmul.f32 0.0078125, %v489_v7 }
 0x28c   : > { %v509_v10 = vadd.f32 1e-05, %v501_v8  ;;  %v510_v14 = vadd.f32 1e-05, %v502_v11 }
 0x28d   : > { %v491_v12 = vpop.xlane.xlu1 %490  ;;  %v493_v16 = vpop.xlane.xlu0 %492 }
 0x28e   : > { %931 = vrsqrt.f32 %v509_v10  ;;  %v503_v13 = vmul.f32 0.0078125, %v491_v12  ;;  %v504_v19 = vmul.f32 0.0078125, %v493_v16 }
 0x290   : > { %v511_v15 = vadd.f32 1e-05, %v503_v13  ;;  %v512_v23 = vadd.f32 1e-05, %v504_v19 }
 0x291   : > { %v495_v17 = vpop.xlane.xlu1 %494  ;;  %v497_v24 = vpop.xlane.xlu0 %496 }
 0x292   : > { %933 = vrsqrt.f32 %v511_v15  ;;  %v505_v18 = vmul.f32 0.0078125, %v495_v17  ;;  %v506_v35 = vmul.f32 0.0078125, %v497_v24 }
 0x293   : > { %935 = vrsqrt.f32 %v510_v14 }
 0x294   : > { %v930_v20 = vpop.eup %929  ;;  %v513_v9 = vadd.f32 1e-05, %v505_v18  ;;  %v514_v27 = vadd.f32 1e-05, %v506_v35 }
 0x295   : > { %v499_v21 = vpop.xlane.xlu1 %498  ;;  %v524_v32 = vmul.f32 %v930_v20, %v1310_v39 }
 0x296   : > { %937 = vrsqrt.f32 %v513_v9  ;;  %v507_v34 = vmul.f32 0.0078125, %v499_v21 }
 0x297   : > { %939 = vrsqrt.f32 %v512_v23 }
 0x298   : > { %v932_v22 = vpop.eup %931  ;;  %v515_v37 = vadd.f32 1e-05, %v507_v34 }
 0x299   : > { %v525_v33 = vmul.f32 %v932_v22, %v1316_v30 }
 0x29a   : > { %941 = vrsqrt.f32 %v515_v37 }
 0x29b   : > { %v840_v26 = vpack.c.bf16 %v525_v33, %v524_v32  ;;  %943 = vrsqrt.f32 %v514_v27 }
 0x29c   : > { %v934_v25 = vpop.eup %933 }
 0x29d   : > { %841 = vmatpush3.bf16.xpose.msra.mxu1 %v840_v26  ;;  %v936_v36 = vpop.eup %935  ;;  %v527_v38 = vmul.f32 %v934_v25, %v1322_v49 }
 0x29e   : > { %842 = vmatprep.subr.bf16.mxu1 %v1079_v1  ;;  %v526_v28 = vmul.f32 %v936_v36, %v1314_v29 }
 0x2a0   : > { %v843_v40 = vpack.c.bf16 %v527_v38, %v526_v28  ;;  %v938_v39 = vpop.eup %937 }
 0x2a1   : > { %v940_v41 = vpop.eup %939  ;;  %v529_v42 = vmul.f32 %v938_v39, %v1330_v57 }
 0x2a2   : > { %v528_v43 = vmul.f32 %v940_v41, %v1324_v50 }
 0x2a4   : > { %v846_v30 = vpack.c.bf16 %v529_v42, %v528_v43  ;;  %v942_v44 = vpop.eup %941 }
 0x2a5   : > { %844 = vmatpush3.bf16.xpose.msra.mxu1 %v843_v40  ;;  %v944_v45 = vpop.eup %943  ;;  %v531_v29 = vmul.f32 %v942_v44, %v1338_v63 }
 0x2a6   : > { %845 = vmatprep.subr.bf16.mxu1 %v1079_v1  ;;  %v530_v31 = vmul.f32 %v944_v45, %v1332_v58 }
 0x2a8   : > { %v849_v46 = vpack.c.bf16 %v531_v29, %v530_v31 }
 0x2ad   : > { %847 = vmatpush3.bf16.xpose.msra.mxu1 %v846_v30 }
 0x2ae   : > { %848 = vmatprep.subr.bf16.mxu1 %v1079_v1 }
 0x2b5   : > { %850 = vmatpush3.bf16.xpose.msra.mxu1 %v849_v46 }
 0x2bc   : > { %805 = vmatmul.mubr.f32.vlgmr.msra.gmra.mrb[0].mxu1 %v532_v47 }
 0x38f   : > { %v601_v49 = vpop.f32.mrb[0].mxu1 }
 0x390   : > { %v602_v50 = vadd.f32 %v601_v49, %v534_v48  ;;  %v806_v51 = vpop.f32.mrb[1].mxu1 }
 0x392   : > { %606 = vst.msk [vmem:[%s257_s8] sm:$0x1] %vm605_vm1, %v602_v50 }
 0x393   : > { %1016 = shalt.err (!%p1013_p7)
}
 0x394   : > { %s1017_s16 = scalar_lea.hbm %s1358_s13, 16  ;;  %s1021_s27 = scalar_lea.hbm %s1406_s5, 64 }
 0x395   : > { %p1018_p9 = scmp.ne.s32.totalorder %s1358_s13, %s1017_s16  ;;  %p1022_p5 = scmp.lt.u32.totalorder %s1358_s13, %s1406_s5 }
 0x396   : > { %p1023_p10 = scmp.lt.u32.totalorder %s1021_s27, %s1017_s16  ;;  %p1025_p4 = scmp.lt.u32.totalorder %s1017_s16, %s1358_s13 }
 0x397   : > { %p1019_p1 = pnand %p1018_p9, %p1202_p12 }
 0x398   : > { %p1024_p2 = por %p1023_p10, %p1022_p5 }
 0x399   : > { %p1020_p0 = pneg %p1019_p1 }
 0x39a   : > { %p1026_p6 = por %p1025_p4, %p1024_p2 }
 0x39c   : > { %p1027_p8 = pnand %p1026_p6, %p1020_p0 }
 0x39e   : > { %1030 = shalt.err (!%p1027_p8)
}
 0x39f   : > { %857 = dma.vmem_to_hbm [thread:$0]  (%p1202_p12), %s1360_s15, 16, %s1358_s13, %s608_s29  }
 0x3a0 PF: > { %p874_p11 = scmp.ge.s32.totalorder %s1073_s23, 2  ;;  %s632_s14 = sand.u32 1, %s1061_s20  }
 0x3a1   : > { %p1421_p13 = scmp.ne.s32.totalorder %s1411_s26, 0  ;;  %s633_s7 = scalar_lea.sflag [#allocation5], %s632_s14 }
 0x3a3   : > { %p868_p3 = pnand %p874_p11, %p1421_p13 }
 0x3a5   : > { %1056 = dma.done.wait (!%p868_p3), %s633_s7, 16  }
 0x3a6   : > { %1058 = vsyncadd (!%p868_p3), %s633_s7, 4294967280  ;;  %p20_p7 = scmp.ge.s32.totalorder %s1169_s6, 6   ;;  %s1422_s20 = smov %s1065_s21 }
 0x3a7   : > { %s1423_s21 = smov %s1069_s22  ;;  %s1424_s22 = smov %s1198_s28 }
 0x3a8   : > { %s1425_s23 = smov %s1169_s6  ;;  %22 = sbr.rel (!%p20_p7) target bundleno = 8 (0x8), region = 89 }
 0x3af   :  { %637 = vsyncpa [#allocation4], 1 }
 0x3b0   :  { %639 = vsyncpa [#allocation4 + $0x1], 1 }
 0x3b1   :  { %640 = vsyncpa [#allocation7], 1 }
 0x3b2   :  { %641 = vsyncpa [#allocation5], 1 }
 0x3b3   :  { %643 = vsyncpa [#allocation5 + $0x1], 1 }

// kernel: tpu_custom_call.1
= control target key start
LH: loop header
LB: loop body
LE: loop exit
PB: predicated region body
PF: predicated region fallthrough
CT: control target
= control target key end

     0   :  { %s1401_s0 = inlined_call_operand.hbm [shape: f32[256,128], index: 0, kind: input, shape index: {}]   ;;  %s1402_s1 = inlined_call_operand.hbm [shape: f32[128,128], index: 1, kind: input, shape index: {}]   ;;  %s1403_s2 = inlined_call_operand.vmem [shape: f32[1,128], index: 2, kind: input, shape index: {}]   ;;  %s1404_s3 = inlined_call_operand.vmem [shape: f32[1,128], index: 3, kind: input, shape index: {}]   ;;  %s1405_s4 = inlined_call_operand.<no memory space> [shape: f32[1], index: 4, kind: input, shape index: {}]   ;;  %s1406_s5 = inlined_call_operand.hbm [shape: f32[4,1,64], index: 5, kind: output, shape index: {}]  }
   0x1   :  { %10 = sst [smem:[#allocation2]] %s1405_s4 }
   0x2   :  { %11 = vsyncpa [#allocation4], 0 }
   0x3   :  { %13 = vsyncpa [#allocation4 + $0x1], 0 }
   0x4   :  { %14 = vsyncpa [#allocation7], 0 }
   0x5   :  { %15 = vsyncpa [#allocation5], 0 }
   0x6   :  { %17 = vsyncpa [#allocation5 + $0x1], 0  ;;  %s1116_s20 = smov 0   ;;  %s1118_s21 = smov 0  }
   0x7   :  { %s1120_s22 = smov 0   ;;  %s1122_s23 = smov 0  }
   0x8 LB: > { %s1137_s4 = sadd.s32 4294967295, %s1073_s23   ;;  %s696_s24 = sadd.s32 4294967294, %s1073_s23   ;;  %s1073_s23 = sphi %s1122_s23, %s1425_s23   ;;  %s1069_s22 = sphi %s1120_s22, %s1424_s22   ;;  %s1065_s21 = sphi %s1118_s21, %s1423_s21   ;;  %s1061_s20 = sphi %s1116_s20, %s1422_s20  }
   0x9   : > { %p43_p0 = scmp.ne.s32.totalorder %s1065_s21, %s1061_s20  ;;  %p1407_p1 = scmp.eq.s32.totalorder %s1137_s4, 0 }
   0xa   : > { %p157_p3 = scmp.eq.s32.totalorder %s696_s24, 3  ;;  %p697_p5 = scmp.ge.s32.totalorder %s1073_s23, 1 }
   0xb   : > { %p1146_p4 = por %p1407_p1, %p43_p0  ;;  %p164_p7 = scmp.lt.s32.totalorder %s1073_s23, 5 }
   0xc   : > { %p1151_p6 = por %p157_p3, %p43_p0  ;;  %s1075_s28 = smov [#allocation6]  }
   0xd   : > { %s1410_s25 = scalar_select %p1146_p4, 1, 0 }
   0xe   : > { %s1411_s26 = scalar_select %p1151_p6, 1, 0 }
   0xf   : > { %p1156_p8 = pnand %p697_p5, %p164_p7  ;;  %s176_s29 = sshll.u32 %s1075_s28, 4  ;;  %s177_s29 = int_to_ptr.vmem [resolvable:$true] %s176_s29 }
  0x10   : > { %s1169_s6 = sadd.s32 1, %s1073_s23   ;;  %s30_s7 = sadd.s32 1, %s1069_s22 }
  0x11   : > { %s1412_s27 = scalar_select %p1156_p8, 1, 0 }
  0x12   : > { %p859_p9 = pneg %p1156_p8  ;;  %s27_s8 = ssub.s32 %s1073_s23, %s1169_s6 }
  0x13   : > { %s945_s11 = scalar_lea.hbm %s1402_s1, 2048 }
  0x14   : > { %p1164_p10 = pnand %p859_p9, %p1407_p1  ;;  %p946_p11 = scmp.ne.s32.totalorder %s1402_s1, %s945_s11 }
  0x15   : > { %p952_p3 = scmp.lt.u32.totalorder %s945_s11, %s1402_s1 }
  0x16   : > { %p947_p12 = pneg %p1164_p10 }
  0x18   : > { %p948_p13 = pnand %p947_p12, %p946_p11 }
  0x1a   : > { %p949_p0 = pneg %p948_p13 }
  0x1c   : > { %p954_p5 = pnand %p952_p3, %p949_p0 }
  0x1e   : > { %957 = shalt.err (!%p954_p5)
}
  0x1f   : > { %s958_s16 = scalar_lea.vmem %s177_s29, 2048  ;;  %p966_p2 = scmp.lt.s32.totalorder %s177_s29, %s177_s29 }
  0x20   : > { %p959_p7 = scmp.ne.s32.totalorder %s177_s29, %s958_s16  ;;  %p967_p6 = scmp.lt.s32.totalorder %s958_s16, %s958_s16 }
  0x22   : > { %p961_p9 = pnand %p959_p7, %p947_p12  ;;  %p968_p4 = por %p967_p6, %p966_p2 }
  0x24   : > { %p962_p1 = pneg %p961_p9 }
  0x26   : > { %p969_p8 = pnand %p968_p4, %p962_p1 }
  0x28   : > { %972 = shalt.err (!%p969_p8)
}
  0x29   : > { %s1076_s17 = smov 128   ;;  %s1077_s18 = smov 8  }
  0x2a   : > { %862 = dma.hbm_to_vmem [thread:$0]  (!%p1164_p10), %s1402_s1, 2048, %s177_s29, [#allocation7], %s1076_s17, %s1076_s17, %s1077_s18  }
  0x2b   : > { %p28_p1 = scmp.eq.s32.totalorder %s27_s8, 0  ;;  %p37_p2 = scmp.ne.s32.totalorder %s1069_s22, %s1065_s21 }
  0x2c   : > { %p38_p4 = scmp.eq.s32.totalorder %s1073_s23, 0  ;;  %p872_p6 = scmp.lt.s32.totalorder %s1073_s23, 4 }
  0x2d   : > { %s1198_s28 = scalar_select %p28_p1, %s1069_s22, %s30_s7  }
  0x2e   : > { %p39_p8 = por %p38_p4, %p37_p2  ;;  %p1414_p11 = scmp.eq.s32.totalorder %s1137_s4, 3 }
  0x2f   : > { %s199_s30 = sand.u32 1, %s1069_s22   ;;  %s710_s10 = sshll.u32 %s1073_s23, 10 }
  0x30   : > { %p1202_p12 = por %p1414_p11, %p37_p2  ;;  %s700_s11 = sshll.u32 %s199_s30, 6 }
  0x31   : > { %s1211_s14 = scalar_lea.hbm %s1401_s0, %s710_s10  ;;  %s203_s29 = scalar_lea.vmem [#allocation3], %s700_s11 }
  0x32   : > { %s210_s7 = sshll.u32 %s203_s29, 4  ;;  %p1213_p10 = pnand %p872_p6, %p39_p8  ;;  %s1217_s7 = int_to_ptr.vmem [resolvable:$true] %s210_s7 }
  0x33   : > { %s1219_s15 = scalar_lea.sflag [#allocation4], %s199_s30  ;;  %s973_s16 = scalar_lea.hbm %s1211_s14, 1024 }
  0x34   : > { %p974_p13 = scmp.ne.s32.totalorder %s1211_s14, %s973_s16  ;;  %p975_p0 = pneg %p1213_p10 }
  0x35   : > { %s978_s10 = scalar_lea.hbm %s1401_s0, 4096  ;;  %p979_p7 = scmp.lt.u32.totalorder %s1211_s14, %s1401_s0 }
  0x36   : > { %p976_p3 = pnand %p975_p0, %p974_p13  ;;  %p980_p9 = scmp.lt.u32.totalorder %s978_s10, %s973_s16 }
  0x37   : > { %p982_p2 = scmp.lt.u32.totalorder %s973_s16, %s1211_s14 }
  0x38   : > { %p977_p5 = pneg %p976_p3  ;;  %p981_p1 = por %p980_p9, %p979_p7 }
  0x3a   : > { %p983_p4 = por %p982_p2, %p981_p1 }
  0x3c   : > { %p984_p6 = pnand %p983_p4, %p977_p5 }
  0x3e   : > { %987 = shalt.err (!%p984_p6)
}
  0x3f   : > { %s988_s30 = scalar_lea.vmem %s1217_s7, 1024  ;;  %s1078_s13 = smov [#allocation3]  }
  0x40   : > { %p989_p8 = scmp.ne.s32.totalorder %s1217_s7, %s988_s30  ;;  %s993_s29 = sshll.u32 %s1078_s13, 4  ;;  %s994_s29 = int_to_ptr.vmem [resolvable:$false] %s993_s29 }
  0x41   : > { %s995_s19 = scalar_lea.vmem %s994_s29, 2048  ;;  %p996_p3 = scmp.lt.s32.totalorder %s1217_s7, %s994_s29 }
  0x42   : > { %p991_p11 = pnand %p989_p8, %p975_p0  ;;  %p997_p7 = scmp.lt.s32.totalorder %s995_s19, %s988_s30 }
  0x44   : > { %p992_p13 = pneg %p991_p11  ;;  %p998_p9 = por %p997_p7, %p996_p3 }
  0x46   : > { %p999_p1 = pnand %p998_p9, %p992_p13 }
  0x48   : > { %1002 = shalt.err (!%p999_p1)
}
  0x49   : > { %866 = dma.hbm_to_vmem [thread:$0]  (!%p1213_p10), %s1211_s14, 1024, %s1217_s7, %s1219_s15, %s1076_s17, %s1076_s17, %s1077_s18  }
  0x4a   : > { %p1417_p0 = scmp.ne.s32.totalorder %s1412_s27, 0 }
  0x4b   : > { %s1253_s16 = sand.u32 (!%p1417_p0), 1, %s1065_s21   ;;  %p1418_p5 = scmp.ne.s32.totalorder (!%p1417_p0), %s1410_s25, 0 }
  0x4c   : > { %222 = sbr.rel (%p1417_p0) target bundleno = 928 (0x3a0), region = 40  ;;  %s704_s24 = sshll.u32 (!%p1417_p0), %s1253_s16, 6 }
  0x4d   : > { %s225_s10 = scalar_lea.sflag (!%p1417_p0), [#allocation4], %s1253_s16  ;;  %s1257_s11 = scalar_lea.vmem (!%p1417_p0), [#allocation3], %s704_s24 }
  0x53   : > { %1048 = dma.done.wait (%p1418_p5), %s225_s10, 1024  }
  0x54   : > { %1050 = vsyncadd (%p1418_p5), %s225_s10, 4294966272  ;;  %p1419_p10 = scmp.eq.s32.totalorder %s1137_s4, 0 }
  0x56   : > { %1052 = dma.done.wait (%p1419_p10), [#allocation7], 2048   ;;  %p1420_p2 = pmov %p1419_p10 }
  0x57   : > { %v267_v0 = vld [vmem:[#allocation6] sm:$0xff]  ;;  %v268_v1 = vld [vmem:[#allocation6 + $0x8] sm:$0xff]  ;;  %v269_v2 = vld [vmem:[#allocation6 + $0x10] sm:$0xff]  ;;  %vm1080_vm0 = vmmov 0   ;;  %s533_s14 = sld [smem:[#allocation2]]  ;;  %s707_s7 = sshll.u32 %s1137_s4, 4 }
  0x58   : > { %1054 = vsyncadd (%p1420_p2), [#allocation7], 4294965248  ;;  %v807_v3 = vpack.c.bf16 %v268_v1, %v267_v0  ;;  %v270_v4 = vld [vmem:[#allocation6 + $0x18] sm:$0xff]  ;;  %v271_v6 = vld [vmem:[#allocation6 + $0x20] sm:$0xff]  ;;  %s257_s8 = scalar_lea.vmem [#allocation8], %s1253_s16  ;;  %vm605_vm1 = vcmask 516096   ;;  %s1358_s13 = scalar_lea.hbm %s1406_s5, %s707_s7 }
  0x59   : > { %v811_v5 = vpack.c.bf16 %v270_v4, %v269_v2  ;;  %v272_v7 = vld [vmem:[#allocation6 + $0x28] sm:$0xff]  ;;  %v1268_v9 = vld [vmem:[%s1257_s11] sm:$0xff]  ;;  %v273_v10 = vld [vmem:[#allocation6 + $0x30] sm:$0xff]  ;;  %s620_s15 = sshll.u32 %s257_s8, 4  ;;  %s608_s29 = scalar_lea.sflag [#allocation5], %s1253_s16  ;;  %s1360_s15 = int_to_ptr.vmem [resolvable:$true] %s620_s15 }
  0x5a   : > { %808 = vmatprep.subr.bf16.mxu0 %v807_v3  ;;  %v815_v8 = vpack.c.bf16 %v272_v7, %v271_v6  ;;  %v274_v11 = vld [vmem:[#allocation6 + $0x38] sm:$0xff]  ;;  %776 = vmatprep.mubr.f32.mxu0 %v1268_v9  ;;  %v275_v13 = vld [vmem:[#allocation6 + $0x40] sm:$0xff]  ;;  %v276_v14 = vld [vmem:[#allocation6 + $0x48] sm:$0xff]  ;;  %s1003_s19 = scalar_lea.vmem %s1360_s15, 16  ;;  %s1082_s4 = smov [#allocation8]  }
  0x5b   : > { %810 = vmatpush3.bf16.msra.mxu0 %v807_v3  ;;  %v819_v12 = vpack.c.bf16 %v274_v11, %v273_v10  ;;  %v823_v15 = vpack.c.bf16 %v276_v14, %v275_v13  ;;  %v277_v16 = vld [vmem:[#allocation6 + $0x50] sm:$0xff]  ;;  %v278_v17 = vld [vmem:[#allocation6 + $0x58] sm:$0xff]  ;;  %v279_v19 = vld [vmem:[#allocation6 + $0x60] sm:$0xff]  ;;  %p1004_p4 = scmp.ne.s32.totalorder %s1360_s15, %s1003_s19  ;;  %s1007_s24 = sshll.u32 %s1082_s4, 4  ;;  %s1008_s24 = int_to_ptr.vmem [resolvable:$false] %s1007_s24 }
  0x5c   : > { %812 = vmatprep.subr.bf16.mxu0 %v811_v5  ;;  %v827_v18 = vpack.c.bf16 %v278_v17, %v277_v16  ;;  %v280_v20 = vld [vmem:[#allocation6 + $0x68] sm:$0xff]  ;;  %v281_v22 = vld [vmem:[#allocation6 + $0x70] sm:$0xff]  ;;  %v282_v23 = vld [vmem:[#allocation6 + $0x78] sm:$0xff]  ;;  %s1009_s10 = scalar_lea.vmem %s1008_s24, 32  ;;  %p1010_p11 = scmp.lt.s32.totalorder %s1360_s15, %s1008_s24 }
  0x5d   : > { %v831_v21 = vpack.c.bf16 %v280_v20, %v279_v19  ;;  %v835_v24 = vpack.c.bf16 %v282_v23, %v281_v22  ;;  %v1272_v25 = vld [vmem:[%s1257_s11 + $0x8] sm:$0xff]  ;;  %v1275_v26 = vld [vmem:[%s1257_s11 + $0x10] sm:$0xff]  ;;  %v1280_v27 = vld [vmem:[%s1257_s11 + $0x18] sm:$0xff]  ;;  %p1005_p6 = pnand %p1004_p4, %p1202_p12  ;;  %p1011_p13 = scmp.lt.s32.totalorder %s1009_s10, %s1003_s19 }
  0x5e   : > { %v1283_v28 = vld [vmem:[%s1257_s11 + $0x20] sm:$0xff]  ;;  %v1288_v29 = vld [vmem:[%s1257_s11 + $0x28] sm:$0xff]  ;;  %v1291_v30 = vld [vmem:[%s1257_s11 + $0x30] sm:$0xff] }
  0x5f   : > { %814 = vmatpush3.bf16.msra.mxu0 %v811_v5  ;;  %v1296_v31 = vld [vmem:[%s1257_s11 + $0x38] sm:$0xff]  ;;  %v706_v32 = vld [vmem:[%s1403_s2] ss:$0 sm:$0xff]  ;;  %p1006_p8 = pneg %p1005_p6  ;;  %p1012_p3 = por %p1011_p13, %p1010_p11 }
  0x60   : > { %816 = vmatprep.subr.bf16.mxu0 %v815_v8 }
  0x61   : > { %p1013_p7 = pnand %p1012_p3, %p1006_p8 }
  0x63   : > { %818 = vmatpush3.bf16.msra.mxu0 %v815_v8 }
  0x64   : > { %820 = vmatprep.subr.bf16.mxu0 %v819_v12 }
  0x67   : > { %822 = vmatpush3.bf16.msra.mxu0 %v819_v12 }
  0x68   : > { %824 = vmatprep.subr.bf16.mxu0 %v823_v15 }
  0x6b   : > { %826 = vmatpush3.bf16.msra.mxu0 %v823_v15 }
  0x6c   : > { %828 = vmatprep.subr.bf16.mxu0 %v827_v18 }
  0x6f   : > { %830 = vmatpush3.bf16.msra.mxu0 %v827_v18 }
  0x70   : > { %832 = vmatprep.subr.bf16.mxu0 %v831_v21 }
  0x73   : > { %834 = vmatpush3.bf16.msra.mxu0 %v831_v21 }
  0x74   : > { %836 = vmatprep.subr.bf16.mxu0 %v835_v24 }
  0x77   : > { %838 = vmatpush3.bf16.msra.mxu0 %v835_v24 }
  0x7a   : > { %777 = vmatmul.mubr.f32.vlgmr.msra.gmra.mrb[0].mxu0 %v1272_v25 }
  0x7b   : > { %779 = vmatprep.mubr.f32.mxu0 %v1275_v26 }
  0x7e   : > { %780 = vmatmul.mubr.f32.gmra.mrb[2].mxu0 %v1280_v27 }
  0x7f   : > { %782 = vmatprep.mubr.f32.mxu0 %v1283_v28 }
  0x82   : > { %783 = vmatmul.mubr.f32.gmra.mrb[4].mxu0 %v1288_v29 }
  0x83   : > { %785 = vmatprep.mubr.f32.mxu0 %v1291_v30 }
  0x86   : > { %786 = vmatmul.mubr.f32.gmra.mrb[6].mxu0 %v1296_v31 }
 0x14d   : > { %v778_v33 = vpop.f32.mrb[0].mxu0 }
 0x14e   : > { %v362_v34 = vadd.f32 %v778_v33, %v706_v32  ;;  %v356_v35 = vpop.f32.mrb[1].mxu0 }
 0x14f   : > { %v357_v36 = vadd.f32 %v706_v32, %v356_v35 }
 0x150   : > { %v404_v37 = vmul.f32 0.70710677, %v362_v34  ;;  %v396_v63 = vmul.f32 0.5, %v362_v34 }
 0x151   : > { %v403_v38 = vmul.f32 0.70710677, %v357_v36  ;;  %v781_v39 = vpop.f32.mrb[2].mxu0  ;;  %v395_v59 = vmul.f32 0.5, %v357_v36 }
 0x152   : > { %913 = verf.f32 %v404_v37  ;;  %v372_v40 = vadd.f32 %v781_v39, %v706_v32  ;;  %v366_v41 = vpop.f32.mrb[3].mxu0 }
 0x153   : > { %915 = verf.f32 %v403_v38  ;;  %v367_v42 = vadd.f32 %v706_v32, %v366_v41 }
 0x154   : > { %v406_v43 = vmul.f32 0.70710677, %v372_v40  ;;  %v398_v7 = vmul.f32 0.5, %v372_v40 }
 0x155   : > { %v405_v44 = vmul.f32 0.70710677, %v367_v42  ;;  %v784_v45 = vpop.f32.mrb[4].mxu0  ;;  %v397_v3 = vmul.f32 0.5, %v367_v42 }
 0x156   : > { %917 = verf.f32 %v406_v43  ;;  %v382_v46 = vadd.f32 %v784_v45, %v706_v32  ;;  %v376_v47 = vpop.f32.mrb[5].mxu0 }
 0x157   : > { %919 = verf.f32 %v405_v44  ;;  %v377_v48 = vadd.f32 %v706_v32, %v376_v47 }
 0x158   : > { %v408_v49 = vmul.f32 0.70710677, %v382_v46  ;;  %v400_v12 = vmul.f32 0.5, %v382_v46 }
 0x159   : > { %v407_v50 = vmul.f32 0.70710677, %v377_v48  ;;  %v787_v51 = vpop.f32.mrb[6].mxu0  ;;  %v399_v13 = vmul.f32 0.5, %v377_v48 }
 0x15a   : > { %921 = verf.f32 %v408_v49  ;;  %v392_v52 = vadd.f32 %v787_v51, %v706_v32  ;;  %v386_v53 = vpop.f32.mrb[7].mxu0 }
 0x15b   : > { %923 = verf.f32 %v407_v50  ;;  %v387_v54 = vadd.f32 %v706_v32, %v386_v53 }
 0x15c   : > { %v914_v55 = vpop.eup %913  ;;  %v410_v56 = vmul.f32 0.70710677, %v392_v52  ;;  %v402_v22 = vmul.f32 0.5, %v392_v52 }
 0x15d   : > { %v916_v57 = vpop.eup %915  ;;  %v409_v58 = vmul.f32 0.70710677, %v387_v54  ;;  %v420_v61 = vadd.f32 1.0, %v914_v55  ;;  %v401_v20 = vmul.f32 0.5, %v387_v54 }
 0x15e   : > { %925 = verf.f32 %v410_v56  ;;  %v419_v60 = vadd.f32 1.0, %v916_v57 }
 0x15f   : > { %927 = verf.f32 %v409_v58  ;;  %v428_v6 = vmul.f32 %v420_v61, %v396_v63 }
 0x160   : > { %v918_v62 = vpop.eup %917  ;;  %v427_v0 = vmul.f32 %v419_v60, %v395_v59 }
 0x161   : > { %v920_v1 = vpop.eup %919  ;;  %v422_v2 = vadd.f32 1.0, %v918_v62  ;;  %v436_v16 = vadd.f32 %v428_v6, %v1272_v25 }
 0x162   : > { %v435_v4 = vadd.f32 %v427_v0, %v1268_v9  ;;  %v421_v5 = vadd.f32 1.0, %v920_v1  ;;  %v1079_v1 = vmov 0.0|0.0  }
 0x163   : > { %v430_v14 = vmul.f32 %v422_v2, %v398_v7  ;;  %839 = vmatprep.subr.bf16.mxu1 %v1079_v1  ;;  %v1081_v2 = vmov 0.0  }
 0x164   : > { %v922_v8 = vpop.eup %921  ;;  %443 = vadd.xlane.f32.xlu0 %v435_v4  ;;  %v429_v10 = vmul.f32 %v421_v5, %v397_v3  ;;  %804 = vmatprep.mubr.msk.f32.mxu1 %vm1080_vm0, %v1081_v2 }
 0x165   : > { %v924_v11 = vpop.eup %923  ;;  %v424_v18 = vadd.f32 1.0, %v922_v8  ;;  %v438_v23 = vadd.f32 %v430_v14, %v1280_v27 }
 0x166   : > { %v437_v15 = vadd.f32 %v429_v10, %v1275_v26  ;;  %v423_v17 = vadd.f32 1.0, %v924_v11 }
 0x167   : > { %v432_v32 = vmul.f32 %v424_v18, %v400_v12 }
 0x168   : > { %v926_v19 = vpop.eup %925  ;;  %447 = vadd.xlane.f32.xlu1 %v437_v15  ;;  %445 = vadd.xlane.f32.xlu0 %v436_v16  ;;  %v431_v9 = vmul.f32 %v423_v17, %v399_v13 }
 0x169   : > { %v928_v21 = vpop.eup %927  ;;  %v426_v34 = vadd.f32 1.0, %v926_v19  ;;  %v440_v25 = vadd.f32 %v432_v32, %v1288_v29 }
 0x16a   : > { %v439_v24 = vadd.f32 %v431_v9, %v1283_v28  ;;  %v425_v33 = vadd.f32 1.0, %v928_v21 }
 0x16b   : > { %v434_v36 = vmul.f32 %v426_v34, %v402_v22 }
 0x16c   : > { %449 = vadd.xlane.f32.xlu1 %v438_v23  ;;  %451 = vadd.xlane.f32.xlu0 %v439_v24  ;;  %v433_v26 = vmul.f32 %v425_v33, %v401_v20 }
 0x16d   : > { %v442_v37 = vadd.f32 %v434_v36, %v1296_v31 }
 0x16e   : > { %v441_v35 = vadd.f32 %v433_v26, %v1291_v30 }
 0x170   : > { %453 = vadd.xlane.f32.xlu1 %v440_v25  ;;  %455 = vadd.xlane.f32.xlu0 %v441_v35 }
 0x174   : > { %457 = vadd.xlane.f32.xlu1 %v442_v37 }
 0x1f1   : > { %v444_v38 = vpop.xlane.xlu0 %443 }
 0x1f2   : > { %v460_v27 = vmul.f32 0.0078125, %v444_v38 }
 0x1f4   : > { %v1310_v39 = vsub.f32 %v435_v4, %v460_v27 }
 0x1f5   : > { %v448_v28 = vpop.xlane.xlu1 %447  ;;  %v446_v40 = vpop.xlane.xlu0 %445 }
 0x1f6   : > { %v462_v41 = vmul.f32 0.0078125, %v448_v28  ;;  %v461_v42 = vmul.f32 0.0078125, %v446_v40  ;;  %v476_v43 = vmul.f32 %v1310_v39, %v1310_v39 }
 0x1f8   : > { %v1314_v29 = vsub.f32 %v437_v15, %v462_v41  ;;  %v1316_v30 = vsub.f32 %v436_v16, %v461_v42  ;;  %484 = vadd.xlane.f32.xlu0 %v476_v43 }
 0x1f9   : > { %v450_v44 = vpop.xlane.xlu1 %449  ;;  %v452_v45 = vpop.xlane.xlu0 %451 }
 0x1fa   : > { %v463_v31 = vmul.f32 0.0078125, %v450_v44  ;;  %v464_v46 = vmul.f32 0.0078125, %v452_v45  ;;  %v478_v47 = vmul.f32 %v1314_v29, %v1314_v29  ;;  %v477_v48 = vmul.f32 %v1316_v30, %v1316_v30 }
 0x1fc   : > { %v1322_v49 = vsub.f32 %v438_v23, %v463_v31  ;;  %v1324_v50 = vsub.f32 %v439_v24, %v464_v46  ;;  %488 = vadd.xlane.f32.xlu0 %v478_v47  ;;  %486 = vadd.xlane.f32.xlu1 %v477_v48  ;;  %v532_v47 = vld [vmem:[%s1404_s3] sm:$0x1]  ;;  %v534_v48 = vstv %s533_s14 }
 0x1fd   : > { %v454_v51 = vpop.xlane.xlu1 %453  ;;  %v456_v52 = vpop.xlane.xlu0 %455 }
 0x1fe   : > { %v465_v53 = vmul.f32 0.0078125, %v454_v51  ;;  %v466_v54 = vmul.f32 0.0078125, %v456_v52  ;;  %v479_v55 = vmul.f32 %v1322_v49, %v1322_v49  ;;  %v480_v56 = vmul.f32 %v1324_v50, %v1324_v50 }
 0x200   : > { %v1330_v57 = vsub.f32 %v440_v25, %v465_v53  ;;  %v1332_v58 = vsub.f32 %v441_v35, %v466_v54  ;;  %490 = vadd.xlane.f32.xlu1 %v479_v55  ;;  %492 = vadd.xlane.f32.xlu0 %v480_v56 }
 0x201   : > { %v458_v59 = vpop.xlane.xlu1 %457 }
 0x202   : > { %v467_v60 = vmul.f32 0.0078125, %v458_v59  ;;  %v481_v61 = vmul.f32 %v1330_v57, %v1330_v57  ;;  %v482_v62 = vmul.f32 %v1332_v58, %v1332_v58 }
 0x204   : > { %v1338_v63 = vsub.f32 %v442_v37, %v467_v60  ;;  %494 = vadd.xlane.f32.xlu1 %v481_v61  ;;  %496 = vadd.xlane.f32.xlu0 %v482_v62 }
 0x206   : > { %v483_v0 = vmul.f32 %v1338_v63, %v1338_v63 }
 0x208   : > { %498 = vadd.xlane.f32.xlu1 %v483_v0 }
 0x285   : > { %v485_v3 = vpop.xlane.xlu0 %484 }
 0x286   : > { %v500_v4 = vmul.f32 0.0078125, %v485_v3 }
 0x288   : > { %v508_v5 = vadd.f32 1e-05, %v500_v4 }
 0x289   : > { %v487_v6 = vpop.xlane.xlu1 %486  ;;  %v489_v7 = vpop.xlane.xlu0 %488 }
 0x28a   : > { %v501_v8 = vmul.f32 0.0078125, %v487_v6  ;;  %929 = vrsqrt.f32 %v508_v5  ;;  %v502_v11 = vmul.f32 0.0078125, %v489_v7 }
 0x28c   : > { %v509_v10 = vadd.f32 1e-05, %v501_v8  ;;  %v510_v14 = vadd.f32 1e-05, %v502_v11 }
 0x28d   : > { %v491_v12 = vpop.xlane.xlu1 %490  ;;  %v493_v16 = vpop.xlane.xlu0 %492 }
 0x28e   : > { %931 = vrsqrt.f32 %v509_v10  ;;  %v503_v13 = vmul.f32 0.0078125, %v491_v12  ;;  %v504_v19 = vmul.f32 0.0078125, %v493_v16 }
 0x290   : > { %v511_v15 = vadd.f32 1e-05, %v503_v13  ;;  %v512_v23 = vadd.f32 1e-05, %v504_v19 }
 0x291   : > { %v495_v17 = vpop.xlane.xlu1 %494  ;;  %v497_v24 = vpop.xlane.xlu0 %496 }
 0x292   : > { %933 = vrsqrt.f32 %v511_v15  ;;  %v505_v18 = vmul.f32 0.0078125, %v495_v17  ;;  %v506_v35 = vmul.f32 0.0078125, %v497_v24 }
 0x293   : > { %935 = vrsqrt.f32 %v510_v14 }
 0x294   : > { %v930_v20 = vpop.eup %929  ;;  %v513_v9 = vadd.f32 1e-05, %v505_v18  ;;  %v514_v27 = vadd.f32 1e-05, %v506_v35 }
 0x295   : > { %v499_v21 = vpop.xlane.xlu1 %498  ;;  %v524_v32 = vmul.f32 %v930_v20, %v1310_v39 }
 0x296   : > { %937 = vrsqrt.f32 %v513_v9  ;;  %v507_v34 = vmul.f32 0.0078125, %v499_v21 }
 0x297   : > { %939 = vrsqrt.f32 %v512_v23 }
 0x298   : > { %v932_v22 = vpop.eup %931  ;;  %v515_v37 = vadd.f32 1e-05, %v507_v34 }
 0x299   : > { %v525_v33 = vmul.f32 %v932_v22, %v1316_v30 }
 0x29a   : > { %941 = vrsqrt.f32 %v515_v37 }
 0x29b   : > { %v840_v26 = vpack.c.bf16 %v525_v33, %v524_v32  ;;  %943 = vrsqrt.f32 %v514_v27 }
 0x29c   : > { %v934_v25 = vpop.eup %933 }
 0x29d   : > { %841 = vmatpush3.bf16.xpose.msra.mxu1 %v840_v26  ;;  %v936_v36 = vpop.eup %935  ;;  %v527_v38 = vmul.f32 %v934_v25, %v1322_v49 }
 0x29e   : > { %842 = vmatprep.subr.bf16.mxu1 %v1079_v1  ;;  %v526_v28 = vmul.f32 %v936_v36, %v1314_v29 }
 0x2a0   : > { %v843_v40 = vpack.c.bf16 %v527_v38, %v526_v28  ;;  %v938_v39 = vpop.eup %937 }
 0x2a1   : > { %v940_v41 = vpop.eup %939  ;;  %v529_v42 = vmul.f32 %v938_v39, %v1330_v57 }
 0x2a2   : > { %v528_v43 = vmul.f32 %v940_v41, %v1324_v50 }
 0x2a4   : > { %v846_v30 = vpack.c.bf16 %v529_v42, %v528_v43  ;;  %v942_v44 = vpop.eup %941 }
 0x2a5   : > { %844 = vmatpush3.bf16.xpose.msra.mxu1 %v843_v40  ;;  %v944_v45 = vpop.eup %943  ;;  %v531_v29 = vmul.f32 %v942_v44, %v1338_v63 }
 0x2a6   : > { %845 = vmatprep.subr.bf16.mxu1 %v1079_v1  ;;  %v530_v31 = vmul.f32 %v944_v45, %v1332_v58 }
 0x2a8   : > { %v849_v46 = vpack.c.bf16 %v531_v29, %v530_v31 }
 0x2ad   : > { %847 = vmatpush3.bf16.xpose.msra.mxu1 %v846_v30 }
 0x2ae   : > { %848 = vmatprep.subr.bf16.mxu1 %v1079_v1 }
 0x2b5   : > { %850 = vmatpush3.bf16.xpose.msra.mxu1 %v849_v46 }
 0x2bc   : > { %805 = vmatmul.mubr.f32.vlgmr.msra.gmra.mrb[0].mxu1 %v532_v47 }
 0x38f   : > { %v601_v49 = vpop.f32.mrb[0].mxu1 }
 0x390   : > { %v602_v50 = vadd.f32 %v601_v49, %v534_v48  ;;  %v806_v51 = vpop.f32.mrb[1].mxu1 }
 0x392   : > { %606 = vst.msk [vmem:[%s257_s8] sm:$0x1] %vm605_vm1, %v602_v50 }
 0x393   : > { %1016 = shalt.err (!%p1013_p7)
}
 0x394   : > { %s1017_s16 = scalar_lea.hbm %s1358_s13, 16  ;;  %s1021_s27 = scalar_lea.hbm %s1406_s5, 64 }
 0x395   : > { %p1018_p9 = scmp.ne.s32.totalorder %s1358_s13, %s1017_s16  ;;  %p1022_p5 = scmp.lt.u32.totalorder %s1358_s13, %s1406_s5 }
 0x396   : > { %p1023_p10 = scmp.lt.u32.totalorder %s1021_s27, %s1017_s16  ;;  %p1025_p4 = scmp.lt.u32.totalorder %s1017_s16, %s1358_s13 }
 0x397   : > { %p1019_p1 = pnand %p1018_p9, %p1202_p12 }
 0x398   : > { %p1024_p2 = por %p1023_p10, %p1022_p5 }
 0x399   : > { %p1020_p0 = pneg %p1019_p1 }
 0x39a   : > { %p1026_p6 = por %p1025_p4, %p1024_p2 }
 0x39c   : > { %p1027_p8 = pnand %p1026_p6, %p1020_p0 }
 0x39e   : > { %1030 = shalt.err (!%p1027_p8)
}
 0x39f   : > { %857 = dma.vmem_to_hbm [thread:$0]  (%p1202_p12), %s1360_s15, 16, %s1358_s13, %s608_s29  }
 0x3a0 PF: > { %p874_p11 = scmp.ge.s32.totalorder %s1073_s23, 2  ;;  %s632_s14 = sand.u32 1, %s1061_s20  }
 0x3a1   : > { %p1421_p13 = scmp.ne.s32.totalorder %s1411_s26, 0  ;;  %s633_s7 = scalar_lea.sflag [#allocation5], %s632_s14 }
 0x3a3   : > { %p868_p3 = pnand %p874_p11, %p1421_p13 }
 0x3a5   : > { %1056 = dma.done.wait (!%p868_p3), %s633_s7, 16  }
 0x3a6   : > { %1058 = vsyncadd (!%p868_p3), %s633_s7, 4294967280  ;;  %p20_p7 = scmp.ge.s32.totalorder %s1169_s6, 6   ;;  %s1422_s20 = smov %s1065_s21 }
 0x3a7   : > { %s1423_s21 = smov %s1069_s22  ;;  %s1424_s22 = smov %s1198_s28 }
 0x3a8   : > { %s1425_s23 = smov %s1169_s6  ;;  %22 = sbr.rel (!%p20_p7) target bundleno = 8 (0x8), region = 89 }
 0x3af   :  { %637 = vsyncpa [#allocation4], 1 }
 0x3b0   :  { %639 = vsyncpa [#allocation4 + $0x1], 1 }
 0x3b1   :  { %640 = vsyncpa [#allocation7], 1 }
 0x3b2   :  { %641 = vsyncpa [#allocation5], 1 }
 0x3b3   :  { %643 = vsyncpa [#allocation5 + $0x1], 1 }

</bundles_post_ra>
